<compile_context>
chip_gen: v7x
topology: tpu7x:2x2x1
jax: 0.10.0
libtpu: 0.0.40
codegen_flags: <defaults>
</compile_context>

<pallas_src>
import math

import jax
import jax.numpy as jnp
from jax.experimental import pallas as pl
from jax.experimental.pallas import tpu as pltpu

EPS = 1e-5


def _encoder_layer_kernel(
    x_ref,      # (S, D)  f32   src rows of this batch element (full sequence)
    xq_ref,     # (S, D)  bf16  src + positional projection (Q/K input)
    bias_ref,   # (1, S)  f32   additive key-mask bias (-1e9 on masked keys)
    wq_ref, bq_ref,     # (D, D) bf16 (1/sqrt(D) pre-folded), (1, D) f32
    wk_ref, bk_ref,     # (D, D) bf16, (1, D) f32
    wv_ref, bv_ref,     # (D, D) bf16, (1, D) f32
    wo_ref, bo_ref,     # (D, D) bf16, (1, D) f32
    g1_ref, be1_ref,    # (1, D) f32   norm1 weight / bias
    w1_ref, b1_ref,     # (D, F) bf16, (1, F) f32
    w2_ref, b2_ref,     # (F, D) bf16, (1, D) f32
    g2_ref, be2_ref,    # (1, D) f32   norm2 weight / bias
    out_ref,            # (tq, D) bf16  output rows for this query tile
    k_scr,              # (S, D) bf16 VMEM scratch: K for this batch element
    v_scr,              # (S, D) bf16 VMEM scratch: V for this batch element
):
    tq = out_ref.shape[0]
    qi = pl.program_id(1)

    # ---- K/V projections for the whole sequence: once per batch element ----
    @pl.when(qi == 0)
    def _():
        k = jnp.dot(xq_ref[...], wk_ref[...],
                    preferred_element_type=jnp.float32) + bk_ref[...]
        v = jnp.dot(x_ref[...].astype(jnp.bfloat16), wv_ref[...],
                    preferred_element_type=jnp.float32) + bv_ref[...]
        k_scr[...] = k.astype(jnp.bfloat16)
        v_scr[...] = v.astype(jnp.bfloat16)

    # ---- this query tile ----
    q_start = pl.multiple_of(qi * tq, tq)
    xq_t = xq_ref[pl.ds(q_start, tq), :]             # (tq, D) bf16
    x_t = x_ref[pl.ds(q_start, tq), :]               # (tq, D) f32

    # Q projection (scale already folded into wq/bq).
    q = jnp.dot(xq_t, wq_ref[...], preferred_element_type=jnp.float32) + bq_ref[...]

    # Scores (tq, S) = Q . K^T  (contract on D), then key-mask bias.
    scores = jax.lax.dot_general(
        q.astype(jnp.bfloat16), k_scr[...],
        dimension_numbers=(((1,), (1,)), ((), ())),
        preferred_element_type=jnp.float32)
    scores = scores + bias_ref[...]                  # (1,S) broadcast over rows

    # Softmax: normalize AFTER the PV matmul (scale (tq,D), not (tq,S)).
    m = jnp.max(scores, axis=-1, keepdims=True)
    p = jnp.exp(scores - m)                          # f32 exp (v5e-safe)
    denom = jnp.sum(p, axis=-1, keepdims=True)
    ctx = jnp.dot(p.astype(jnp.bfloat16), v_scr[...],
                  preferred_element_type=jnp.float32)          # (tq, D)
    ctx = ctx * pl.reciprocal(denom, approx=True)

    attn_out = jnp.dot(ctx.astype(jnp.bfloat16), wo_ref[...],
                       preferred_element_type=jnp.float32) + bo_ref[...]

    # ---- residual + LayerNorm 1  (dropout1 == identity) ----
    h = x_t + attn_out
    mu = jnp.mean(h, axis=-1, keepdims=True)
    var = jnp.mean((h - mu) ** 2, axis=-1, keepdims=True)
    hn = (h - mu) * jax.lax.rsqrt(var + EPS) * g1_ref[...] + be1_ref[...]

    # ---- feed-forward: linear2(dropout(relu(linear1(x)))) ----
    ff = jnp.dot(hn.astype(jnp.bfloat16), w1_ref[...],
                 preferred_element_type=jnp.float32) + b1_ref[...]
    ff = jnp.maximum(ff, 0.0)                        # relu
    ff2 = jnp.dot(ff.astype(jnp.bfloat16), w2_ref[...],
                  preferred_element_type=jnp.float32) + b2_ref[...]

    # ---- residual + LayerNorm 2  (dropout2 == identity) ----
    h2 = hn + ff2
    mu2 = jnp.mean(h2, axis=-1, keepdims=True)
    var2 = jnp.mean((h2 - mu2) ** 2, axis=-1, keepdims=True)
    out = (h2 - mu2) * jax.lax.rsqrt(var2 + EPS) * g2_ref[...] + be2_ref[...]

    out_ref[...] = out.astype(out_ref.dtype)


def prepare_params(params):
    """One-time weight preprocessing (do NOT call per forward step).

    - casts matmul weights to bf16 for the MXU,
    - folds the 1/sqrt(D) attention scale into wq / bq,
    - keeps biases / LayerNorm affine params in f32.
    """
    d_model = params["wq"].shape[0]
    scale = 1.0 / math.sqrt(d_model)
    bf = jnp.bfloat16
    f32 = jnp.float32
    return {
        "wp": params["wp"].astype(f32), "bp": params["bp"].astype(f32),
        "wq": (params["wq"] * scale).astype(bf), "bq": (params["bq"] * scale).astype(f32),
        "wk": params["wk"].astype(bf), "bk": params["bk"].astype(f32),
        "wv": params["wv"].astype(bf), "bv": params["bv"].astype(f32),
        "wo": params["wo"].astype(bf), "bo": params["bo"].astype(f32),
        "g1": params["g1"].astype(f32), "be1": params["be1"].astype(f32),
        "w1": params["w1"].astype(bf), "b1": params["b1"].astype(f32),
        "w2": params["w2"].astype(bf), "b2": params["b2"].astype(f32),
        "g2": params["g2"].astype(f32), "be2": params["be2"].astype(f32),
    }


def encoder_layer_forward(src, positions, masked_elements, prepared,
                          *, q_tile=None, out_dtype=jnp.bfloat16):
    """src: (S, B, D), positions: (S, B, P), masked_elements: (S, B) bool.

    `prepared` is the output of `prepare_params` (computed once).
    Grid is (B, S // q_tile); the batch axis is "parallel" (2-TC on v7x when
    B is even), the query-tile axis "arbitrary" (K/V scratch reuse).
    """
    S, B, D = src.shape
    F = prepared["w1"].shape[1]

    if q_tile is None:
        q_tile = S
        for cand in (256, 128, 64, 32, 16):
            if S % cand == 0:
                q_tile = cand
                break
    assert S % q_tile == 0 and (q_tile == S or q_tile % 8 == 0)
    nq = S // q_tile

    # Wrapper glue (cheap at these sizes): batch-major layout + hoisted
    # positional projection (K=3 matmul on a 3-lane-padded input).
    x = jnp.transpose(src, (1, 0, 2)).astype(jnp.float32)              # (B, S, D)
    pos = jnp.transpose(positions, (1, 0, 2)).astype(jnp.float32)      # (B, S, P)
    xq = (x + pos @ prepared["wp"] + prepared["bp"]).astype(jnp.bfloat16)

    # Additive key-mask bias: -1e9 where masked.
    neg_bias = (jnp.transpose(masked_elements, (1, 0)).astype(jnp.float32)
                * (-1e9))[:, None, :]                                  # (B, 1, S)

    weights = [prepared[k] for k in (
        "wq", "bq", "wk", "bk", "wv", "bv", "wo", "bo",
        "g1", "be1", "w1", "b1", "w2", "b2", "g2", "be2")]

    # Weights live whole-array in VMEM for the duration of the call:
    # single-buffered and never re-fetched across grid steps.
    weight_spec = pl.BlockSpec(memory_space=pltpu.MemorySpace.VMEM)

    in_specs = [
        pl.BlockSpec((None, S, D), lambda b, q: (b, 0, 0)),   # x   (full seq, batch b)
        pl.BlockSpec((None, S, D), lambda b, q: (b, 0, 0)),   # xq  (full seq, batch b)
        pl.BlockSpec((None, 1, S), lambda b, q: (b, 0, 0)),   # key-mask bias
    ] + [weight_spec] * len(weights)

    # Explicit VMEM budget (review: default scoped limits are 16/32 MiB and
    # v7x has only 64 MiB physical per TC).
    def _nbytes(a):
        return int(a.size) * jnp.dtype(a.dtype).itemsize
    out_isz = jnp.dtype(out_dtype).itemsize
    weight_bytes = sum(_nbytes(w) for w in weights)
    act_bytes = 2 * (S * D * 4 + S * D * 2 + S * 4 + q_tile * D * out_isz)  # 2-deep pipeline
    scratch_bytes = 2 * S * D * 2                                            # K/V scratch
    vmem_limit = int(1.5 * (weight_bytes + act_bytes + scratch_bytes)) + (8 << 20)
    vmem_limit = max(32 << 20, min(vmem_limit, 64 << 20))

    out = pl.pallas_call(
        _encoder_layer_kernel,
        out_shape=jax.ShapeDtypeStruct((B, S, D), out_dtype),
        grid=(B, nq),
        in_specs=in_specs,
        out_specs=pl.BlockSpec((None, q_tile, D), lambda b, q: (b, q, 0)),
        scratch_shapes=[pltpu.VMEM((S, D), jnp.bfloat16),    # K (resident per batch elem)
                        pltpu.VMEM((S, D), jnp.bfloat16)],   # V
        compiler_params=pltpu.CompilerParams(
            dimension_semantics=("parallel", "arbitrary"),
            vmem_limit_bytes=vmem_limit),
    )(x, xq, neg_bias, *weights)

    return jnp.transpose(out, (1, 0, 2)).astype(src.dtype)             # back to (S, B, D)


def _reference_forward(src, positions, masked_elements, params):
    """Pure-JAX f32 reference with identical semantics (for verification)."""
    x = src.astype(jnp.float32)                    # (S, B, D)
    pos = positions.astype(jnp.float32)
    S, B, D = x.shape

    pos_emb = pos @ params["wp"] + params["bp"]
    xq = x + pos_emb
    q = xq @ params["wq"] + params["bq"]
    k = xq @ params["wk"] + params["bk"]
    v = x @ params["wv"] + params["bv"]
    scale = 1.0 / math.sqrt(D)
    scores = jnp.einsum("sbd,tbd->bst", q, k) * scale          # (B, S, S)
    key_mask = jnp.transpose(masked_elements, (1, 0))          # (B, S)
    scores = scores - key_mask[:, None, :].astype(jnp.float32) * 1e9
    attn = jax.nn.softmax(scores, axis=-1)
    ctx = jnp.einsum("bst,tbd->sbd", attn, v)
    src2 = ctx @ params["wo"] + params["bo"]

    def ln(h, g, b):
        mu = jnp.mean(h, axis=-1, keepdims=True)
        var = jnp.mean((h - mu) ** 2, axis=-1, keepdims=True)
        return (h - mu) / jnp.sqrt(var + EPS) * g + b

    h = ln(x + src2, params["g1"], params["be1"])
    ff = jnp.maximum(h @ params["w1"] + params["b1"], 0.0)
    ff2 = ff @ params["w2"] + params["b2"]
    return ln(h + ff2, params["g2"], params["be2"])


def _init_params(key, d_model, dim_feedforward, pos_dim):
    ks = jax.random.split(key, 12)
    s = 0.05
    return {
        "wp": jax.random.normal(ks[0], (pos_dim, d_model), jnp.float32) * s,
        "bp": jnp.zeros((1, d_model), jnp.float32),
        "wq": jax.random.normal(ks[1], (d_model, d_model), jnp.float32) * s,
        "bq": jax.random.normal(ks[2], (1, d_model), jnp.float32) * s,
        "wk": jax.random.normal(ks[3], (d_model, d_model), jnp.float32) * s,
        "bk": jax.random.normal(ks[4], (1, d_model), jnp.float32) * s,
        "wv": jax.random.normal(ks[5], (d_model, d_model), jnp.float32) * s,
        "bv": jax.random.normal(ks[6], (1, d_model), jnp.float32) * s,
        "wo": jax.random.normal(ks[7], (d_model, d_model), jnp.float32) * s,
        "bo": jax.random.normal(ks[8], (1, d_model), jnp.float32) * s,
        "g1": jnp.ones((1, d_model), jnp.float32),
        "be1": jnp.zeros((1, d_model), jnp.float32),
        "w1": jax.random.normal(ks[9], (d_model, dim_feedforward), jnp.float32) * s,
        "b1": jax.random.normal(ks[10], (1, dim_feedforward), jnp.float32) * s,
        "w2": jax.random.normal(ks[11], (dim_feedforward, d_model), jnp.float32) * s,
        "b2": jnp.zeros((1, d_model), jnp.float32),
        "g2": jnp.ones((1, d_model), jnp.float32),
        "be2": jnp.zeros((1, d_model), jnp.float32),
    }


if __name__ == "__main__":
    # Small demo shapes: grid = (B=2, S/q_tile=2) = 4 steps, exercising both the
    # K/V scratch-fill (q-tile 0) and scratch-reuse (q-tile 1) paths per batch.
    S, B, D, F, P = 32, 2, 32, 64, 3

    key = jax.random.PRNGKey(0)
    k_src, k_pos, k_par = jax.random.split(key, 3)

    src = jax.random.normal(k_src, (S, B, D), jnp.float32)
    positions = jax.random.normal(k_pos, (S, B, P), jnp.float32)
    masked_elements = jnp.zeros((S, B), jnp.bool_).at[-3:, 0].set(True)  # mask a few keys

    params = _init_params(k_par, D, F, P)
    prepared = prepare_params(params)        # one-time weight prep (bf16 + scale fold)

    out = encoder_layer_forward(src, positions, masked_elements, prepared, q_tile=16)
    out = jax.block_until_ready(out)

    ref = _reference_forward(src, positions, masked_elements, params)
    assert out.shape == (S, B, D)
    # bf16 matmul operands / bf16 output (f32 accumulation) -> relaxed tolerance.
    max_err = float(jnp.max(jnp.abs(out - ref)))
    assert max_err < 5e-2, f"mismatch vs JAX reference, max abs err = {max_err}"

    print("KERNEL_OK")
</pallas_src>

<mosaic_0001>
module attributes {stable_mosaic.version = 11 : i64} {
  func.func @_encoder_layer_kernel(%arg0: i32, %arg1: i32, %arg2: memref<1x32x32xf32, #tpu.memory_space<vmem>>, %arg3: memref<1x32x32xbf16, #tpu.memory_space<vmem>>, %arg4: memref<1x1x32xf32, #tpu.memory_space<vmem>>, %arg5: memref<32x32xbf16, #tpu.memory_space<vmem>>, %arg6: memref<1x32xf32, #tpu.memory_space<vmem>>, %arg7: memref<32x32xbf16, #tpu.memory_space<vmem>>, %arg8: memref<1x32xf32, #tpu.memory_space<vmem>>, %arg9: memref<32x32xbf16, #tpu.memory_space<vmem>>, %arg10: memref<1x32xf32, #tpu.memory_space<vmem>>, %arg11: memref<32x32xbf16, #tpu.memory_space<vmem>>, %arg12: memref<1x32xf32, #tpu.memory_space<vmem>>, %arg13: memref<1x32xf32, #tpu.memory_space<vmem>>, %arg14: memref<1x32xf32, #tpu.memory_space<vmem>>, %arg15: memref<32x64xbf16, #tpu.memory_space<vmem>>, %arg16: memref<1x64xf32, #tpu.memory_space<vmem>>, %arg17: memref<64x32xbf16, #tpu.memory_space<vmem>>, %arg18: memref<1x32xf32, #tpu.memory_space<vmem>>, %arg19: memref<1x32xf32, #tpu.memory_space<vmem>>, %arg20: memref<1x32xf32, #tpu.memory_space<vmem>>, %arg21: memref<1x16x32xbf16, #tpu.memory_space<vmem>>, %arg22: memref<32x32xbf16, #tpu.memory_space<vmem>>, %arg23: memref<32x32xbf16, #tpu.memory_space<vmem>>) attributes {dimension_semantics = [#tpu.dimension_semantics<parallel>, #tpu.dimension_semantics<arbitrary>], iteration_bounds = array<i64: 2, 2>, scalar_prefetch = 0 : i64, scratch_operands = 2 : i64, tpu.core_type = #tpu.core_type<tc>, window_params = [{transform_indices = @transform_0, window_bounds = array<i64: 1, 32, 32>}, {transform_indices = @transform_1, window_bounds = array<i64: 1, 32, 32>}, {transform_indices = @transform_2, window_bounds = array<i64: 1, 1, 32>}, {pipeline_mode = #tpu.pipeline_mode<synchronous>, transform_indices = @transform_3, window_bounds = array<i64: 32, 32>}, {pipeline_mode = #tpu.pipeline_mode<synchronous>, transform_indices = @transform_4, window_bounds = array<i64: 1, 32>}, {pipeline_mode = #tpu.pipeline_mode<synchronous>, transform_indices = @transform_5, window_bounds = array<i64: 32, 32>}, {pipeline_mode = #tpu.pipeline_mode<synchronous>, transform_indices = @transform_6, window_bounds = array<i64: 1, 32>}, {pipeline_mode = #tpu.pipeline_mode<synchronous>, transform_indices = @transform_7, window_bounds = array<i64: 32, 32>}, {pipeline_mode = #tpu.pipeline_mode<synchronous>, transform_indices = @transform_8, window_bounds = array<i64: 1, 32>}, {pipeline_mode = #tpu.pipeline_mode<synchronous>, transform_indices = @transform_9, window_bounds = array<i64: 32, 32>}, {pipeline_mode = #tpu.pipeline_mode<synchronous>, transform_indices = @transform_10, window_bounds = array<i64: 1, 32>}, {pipeline_mode = #tpu.pipeline_mode<synchronous>, transform_indices = @transform_11, window_bounds = array<i64: 1, 32>}, {pipeline_mode = #tpu.pipeline_mode<synchronous>, transform_indices = @transform_12, window_bounds = array<i64: 1, 32>}, {pipeline_mode = #tpu.pipeline_mode<synchronous>, transform_indices = @transform_13, window_bounds = array<i64: 32, 64>}, {pipeline_mode = #tpu.pipeline_mode<synchronous>, transform_indices = @transform_14, window_bounds = array<i64: 1, 64>}, {pipeline_mode = #tpu.pipeline_mode<synchronous>, transform_indices = @transform_15, window_bounds = array<i64: 64, 32>}, {pipeline_mode = #tpu.pipeline_mode<synchronous>, transform_indices = @transform_16, window_bounds = array<i64: 1, 32>}, {pipeline_mode = #tpu.pipeline_mode<synchronous>, transform_indices = @transform_17, window_bounds = array<i64: 1, 32>}, {pipeline_mode = #tpu.pipeline_mode<synchronous>, transform_indices = @transform_18, window_bounds = array<i64: 1, 32>}, {transform_indices = @transform_19, window_bounds = array<i64: 1, 16, 32>}]} {
    %c0_i32 = arith.constant 0 : i32
    %0 = arith.cmpi eq, %arg1, %c0_i32 : i32
    %1 = arith.extui %0 : i1 to i32
    %c0_i32_0 = arith.constant 0 : i32
    %2 = arith.cmpi ne, %1, %c0_i32_0 : i32
    scf.if %2 {
      %c0_56 = arith.constant 0 : index
      %c0_57 = arith.constant 0 : index
      %c0_58 = arith.constant 0 : index
      %110 = vector.load %arg3[%c0_56, %c0_57, %c0_58] : memref<1x32x32xbf16, #tpu.memory_space<vmem>>, vector<1x32x32xbf16>
      %111 = vector.shape_cast %110 : vector<1x32x32xbf16> to vector<32x32xbf16>
      %c0_59 = arith.constant 0 : index
      %c0_60 = arith.constant 0 : index
      %112 = vector.load %arg7[%c0_59, %c0_60] : memref<32x32xbf16, #tpu.memory_space<vmem>>, vector<32x32xbf16>
      %cst_61 = arith.constant dense<0.000000e+00> : vector<32x32xf32>
      %113 = tpu.matmul %111, %112, %cst_61 {dimension_numbers = #tpu.dot_dimension_numbers<[1], [0], [0], [1], [0, 0, 1, 1], [], []>} : vector<32x32xbf16>, vector<32x32xbf16>, vector<32x32xf32> -> vector<32x32xf32>
      %c0_62 = arith.constant 0 : index
      %c0_63 = arith.constant 0 : index
      %114 = vector.load %arg8[%c0_62, %c0_63] : memref<1x32xf32, #tpu.memory_space<vmem>>, vector<1x32xf32>
      %115 = vector.broadcast %114 : vector<1x32xf32> to vector<32x32xf32>
      %116 = arith.addf %113, %115 : vector<32x32xf32>
      %c0_64 = arith.constant 0 : index
      %c0_65 = arith.constant 0 : index
      %c0_66 = arith.constant 0 : index
      %117 = vector.load %arg2[%c0_64, %c0_65, %c0_66] : memref<1x32x32xf32, #tpu.memory_space<vmem>>, vector<1x32x32xf32>
      %118 = vector.shape_cast %117 : vector<1x32x32xf32> to vector<32x32xf32>
      %119 = arith.truncf %118 : vector<32x32xf32> to vector<32x32xbf16>
      %c0_67 = arith.constant 0 : index
      %c0_68 = arith.constant 0 : index
      %120 = vector.load %arg9[%c0_67, %c0_68] : memref<32x32xbf16, #tpu.memory_space<vmem>>, vector<32x32xbf16>
      %cst_69 = arith.constant dense<0.000000e+00> : vector<32x32xf32>
      %121 = tpu.matmul %119, %120, %cst_69 {dimension_numbers = #tpu.dot_dimension_numbers<[1], [0], [0], [1], [0, 0, 1, 1], [], []>} : vector<32x32xbf16>, vector<32x32xbf16>, vector<32x32xf32> -> vector<32x32xf32>
      %c0_70 = arith.constant 0 : index
      %c0_71 = arith.constant 0 : index
      %122 = vector.load %arg10[%c0_70, %c0_71] : memref<1x32xf32, #tpu.memory_space<vmem>>, vector<1x32xf32>
      %123 = vector.broadcast %122 : vector<1x32xf32> to vector<32x32xf32>
      %124 = arith.addf %121, %123 : vector<32x32xf32>
      %125 = arith.truncf %116 : vector<32x32xf32> to vector<32x32xbf16>
      %c0_72 = arith.constant 0 : index
      %c0_73 = arith.constant 0 : index
      %126 = vector.load %arg22[%c0_72, %c0_73] : memref<32x32xbf16, #tpu.memory_space<vmem>>, vector<32x32xbf16>
      tpu.vector_store %arg22[%c0_72, %c0_73], %125 {strides = array<i32>} : memref<32x32xbf16, #tpu.memory_space<vmem>>, vector<32x32xbf16>,
      %127 = arith.truncf %124 : vector<32x32xf32> to vector<32x32xbf16>
      %c0_74 = arith.constant 0 : index
      %c0_75 = arith.constant 0 : index
      %128 = vector.load %arg23[%c0_74, %c0_75] : memref<32x32xbf16, #tpu.memory_space<vmem>>, vector<32x32xbf16>
      tpu.vector_store %arg23[%c0_74, %c0_75], %127 {strides = array<i32>} : memref<32x32xbf16, #tpu.memory_space<vmem>>, vector<32x32xbf16>,
    } else {
    }
    %c16_i32 = arith.constant 16 : i32
    %3 = arith.muli %arg1, %c16_i32 : i32
    %4 = tpu.assume_multiple %3, 16 : i32
    %c0 = arith.constant 0 : index
    %5 = arith.index_cast %4 : i32 to index
    %c0_1 = arith.constant 0 : index
    %6 = vector.load %arg3[%c0, %5, %c0_1] : memref<1x32x32xbf16, #tpu.memory_space<vmem>>, vector<1x16x32xbf16>
    %7 = vector.shape_cast %6 : vector<1x16x32xbf16> to vector<16x32xbf16>
    %c0_2 = arith.constant 0 : index
    %8 = arith.index_cast %4 : i32 to index
    %c0_3 = arith.constant 0 : index
    %9 = vector.load %arg2[%c0_2, %8, %c0_3] : memref<1x32x32xf32, #tpu.memory_space<vmem>>, vector<1x16x32xf32>
    %10 = vector.shape_cast %9 : vector<1x16x32xf32> to vector<16x32xf32>
    %c0_4 = arith.constant 0 : index
    %c0_5 = arith.constant 0 : index
    %11 = vector.load %arg5[%c0_4, %c0_5] : memref<32x32xbf16, #tpu.memory_space<vmem>>, vector<32x32xbf16>
    %cst = arith.constant dense<0.000000e+00> : vector<16x32xf32>
    %12 = tpu.matmul %7, %11, %cst {dimension_numbers = #tpu.dot_dimension_numbers<[1], [0], [0], [1], [0, 0, 1, 1], [], []>} : vector<16x32xbf16>, vector<32x32xbf16>, vector<16x32xf32> -> vector<16x32xf32>
    %c0_6 = arith.constant 0 : index
    %c0_7 = arith.constant 0 : index
    %13 = vector.load %arg6[%c0_6, %c0_7] : memref<1x32xf32, #tpu.memory_space<vmem>>, vector<1x32xf32>
    %14 = vector.broadcast %13 : vector<1x32xf32> to vector<16x32xf32>
    %15 = arith.addf %12, %14 : vector<16x32xf32>
    %16 = arith.truncf %15 : vector<16x32xf32> to vector<16x32xbf16>
    %c0_8 = arith.constant 0 : index
    %c0_9 = arith.constant 0 : index
    %17 = vector.load %arg22[%c0_8, %c0_9] : memref<32x32xbf16, #tpu.memory_space<vmem>>, vector<32x32xbf16>
    %cst_10 = arith.constant dense<0.000000e+00> : vector<16x32xf32>
    %18 = tpu.matmul %16, %17, %cst_10 {dimension_numbers = #tpu.dot_dimension_numbers<[1], [1], [0], [0], [0, 0, 1, 0], [], []>} : vector<16x32xbf16>, vector<32x32xbf16>, vector<16x32xf32> -> vector<16x32xf32>
    %c0_11 = arith.constant 0 : index
    %c0_12 = arith.constant 0 : index
    %c0_13 = arith.constant 0 : index
    %19 = vector.load %arg4[%c0_11, %c0_12, %c0_13] : memref<1x1x32xf32, #tpu.memory_space<vmem>>, vector<1x1x32xf32>
    %20 = vector.shape_cast %19 : vector<1x1x32xf32> to vector<1x32xf32>
    %21 = vector.broadcast %20 : vector<1x32xf32> to vector<16x32xf32>
    %22 = arith.addf %18, %21 : vector<16x32xf32>
    %cst_14 = arith.constant dense<0xFF800000> : vector<16xf32>
    %23 = vector.multi_reduction <maximumf>, %22, %cst_14 [1] : vector<16x32xf32> to vector<16xf32>
    %24 = vector.shape_cast %23 : vector<16xf32> to vector<16x1xf32>
    %25 = vector.broadcast %24 : vector<16x1xf32> to vector<16x32xf32>
    %26 = arith.subf %22, %25 : vector<16x32xf32>
    %27 = math.exp %26 : vector<16x32xf32>
    %cst_15 = arith.constant dense<0.000000e+00> : vector<16xf32>
    %28 = vector.multi_reduction <add>, %27, %cst_15 [1] : vector<16x32xf32> to vector<16xf32>
    %29 = vector.shape_cast %28 : vector<16xf32> to vector<16x1xf32>
    %30 = arith.truncf %27 : vector<16x32xf32> to vector<16x32xbf16>
    %c0_16 = arith.constant 0 : index
    %c0_17 = arith.constant 0 : index
    %31 = vector.load %arg23[%c0_16, %c0_17] : memref<32x32xbf16, #tpu.memory_space<vmem>>, vector<32x32xbf16>
    %cst_18 = arith.constant dense<0.000000e+00> : vector<16x32xf32>
    %32 = tpu.matmul %30, %31, %cst_18 {dimension_numbers = #tpu.dot_dimension_numbers<[1], [0], [0], [1], [0, 0, 1, 1], [], []>} : vector<16x32xbf16>, vector<32x32xbf16>, vector<16x32xf32> -> vector<16x32xf32>
    %33 = tpu.reciprocal %29 {approx = true} : vector<16x1xf32> -> vector<16x1xf32>
    %34 = vector.broadcast %33 : vector<16x1xf32> to vector<16x32xf32>
    %35 = arith.mulf %32, %34 : vector<16x32xf32>
    %36 = arith.truncf %35 : vector<16x32xf32> to vector<16x32xbf16>
    %c0_19 = arith.constant 0 : index
    %c0_20 = arith.constant 0 : index
    %37 = vector.load %arg11[%c0_19, %c0_20] : memref<32x32xbf16, #tpu.memory_space<vmem>>, vector<32x32xbf16>
    %cst_21 = arith.constant dense<0.000000e+00> : vector<16x32xf32>
    %38 = tpu.matmul %36, %37, %cst_21 {dimension_numbers = #tpu.dot_dimension_numbers<[1], [0], [0], [1], [0, 0, 1, 1], [], []>} : vector<16x32xbf16>, vector<32x32xbf16>, vector<16x32xf32> -> vector<16x32xf32>
    %c0_22 = arith.constant 0 : index
    %c0_23 = arith.constant 0 : index
    %39 = vector.load %arg12[%c0_22, %c0_23] : memref<1x32xf32, #tpu.memory_space<vmem>>, vector<1x32xf32>
    %40 = vector.broadcast %39 : vector<1x32xf32> to vector<16x32xf32>
    %41 = arith.addf %38, %40 : vector<16x32xf32>
    %42 = arith.addf %10, %41 : vector<16x32xf32>
    %cst_24 = arith.constant dense<0.000000e+00> : vector<16xf32>
    %43 = vector.multi_reduction <add>, %42, %cst_24 [1] : vector<16x32xf32> to vector<16xf32>
    %44 = vector.shape_cast %43 : vector<16xf32> to vector<16x1xf32>
    %cst_25 = arith.constant 3.200000e+01 : f32
    %45 = vector.broadcast %cst_25 : f32 to vector<16x1xf32>
    %46 = arith.divf %44, %45 : vector<16x1xf32>
    %47 = vector.broadcast %46 : vector<16x1xf32> to vector<16x32xf32>
    %48 = arith.subf %42, %47 : vector<16x32xf32>
    %49 = arith.mulf %48, %48 : vector<16x32xf32>
    %cst_26 = arith.constant dense<0.000000e+00> : vector<16xf32>
    %50 = vector.multi_reduction <add>, %49, %cst_26 [1] : vector<16x32xf32> to vector<16xf32>
    %51 = vector.shape_cast %50 : vector<16xf32> to vector<16x1xf32>
    %cst_27 = arith.constant 3.200000e+01 : f32
    %52 = vector.broadcast %cst_27 : f32 to vector<16x1xf32>
    %53 = arith.divf %51, %52 : vector<16x1xf32>
    %54 = vector.broadcast %46 : vector<16x1xf32> to vector<16x32xf32>
    %55 = arith.subf %42, %54 : vector<16x32xf32>
    %cst_28 = arith.constant 9.99999974E-6 : f32
    %56 = vector.broadcast %cst_28 : f32 to vector<16x1xf32>
    %57 = arith.addf %53, %56 : vector<16x1xf32>
    %58 = math.rsqrt %57 : vector<16x1xf32>
    %59 = vector.broadcast %58 : vector<16x1xf32> to vector<16x32xf32>
    %60 = arith.mulf %55, %59 : vector<16x32xf32>
    %c0_29 = arith.constant 0 : index
    %c0_30 = arith.constant 0 : index
    %61 = vector.load %arg13[%c0_29, %c0_30] : memref<1x32xf32, #tpu.memory_space<vmem>>, vector<1x32xf32>
    %62 = vector.broadcast %61 : vector<1x32xf32> to vector<16x32xf32>
    %63 = arith.mulf %60, %62 : vector<16x32xf32>
    %c0_31 = arith.constant 0 : index
    %c0_32 = arith.constant 0 : index
    %64 = vector.load %arg14[%c0_31, %c0_32] : memref<1x32xf32, #tpu.memory_space<vmem>>, vector<1x32xf32>
    %65 = vector.broadcast %64 : vector<1x32xf32> to vector<16x32xf32>
    %66 = arith.addf %63, %65 : vector<16x32xf32>
    %67 = arith.truncf %66 : vector<16x32xf32> to vector<16x32xbf16>
    %c0_33 = arith.constant 0 : index
    %c0_34 = arith.constant 0 : index
    %68 = vector.load %arg15[%c0_33, %c0_34] : memref<32x64xbf16, #tpu.memory_space<vmem>>, vector<32x64xbf16>
    %cst_35 = arith.constant dense<0.000000e+00> : vector<16x64xf32>
    %69 = tpu.matmul %67, %68, %cst_35 {dimension_numbers = #tpu.dot_dimension_numbers<[1], [0], [0], [1], [0, 0, 1, 1], [], []>} : vector<16x32xbf16>, vector<32x64xbf16>, vector<16x64xf32> -> vector<16x64xf32>
    %c0_36 = arith.constant 0 : index
    %c0_37 = arith.constant 0 : index
    %70 = vector.load %arg16[%c0_36, %c0_37] : memref<1x64xf32, #tpu.memory_space<vmem>>, vector<1x64xf32>
    %71 = vector.broadcast %70 : vector<1x64xf32> to vector<16x64xf32>
    %72 = arith.addf %69, %71 : vector<16x64xf32>
    %cst_38 = arith.constant 0.000000e+00 : f32
    %73 = vector.broadcast %cst_38 : f32 to vector<16x64xf32>
    %74 = arith.maximumf %72, %73 : vector<16x64xf32>
    %75 = arith.truncf %74 : vector<16x64xf32> to vector<16x64xbf16>
    %c0_39 = arith.constant 0 : index
    %c0_40 = arith.constant 0 : index
    %76 = vector.load %arg17[%c0_39, %c0_40] : memref<64x32xbf16, #tpu.memory_space<vmem>>, vector<64x32xbf16>
    %cst_41 = arith.constant dense<0.000000e+00> : vector<16x32xf32>
    %77 = tpu.matmul %75, %76, %cst_41 {dimension_numbers = #tpu.dot_dimension_numbers<[1], [0], [0], [1], [0, 0, 1, 1], [], []>} : vector<16x64xbf16>, vector<64x32xbf16>, vector<16x32xf32> -> vector<16x32xf32>
    %c0_42 = arith.constant 0 : index
    %c0_43 = arith.constant 0 : index
    %78 = vector.load %arg18[%c0_42, %c0_43] : memref<1x32xf32, #tpu.memory_space<vmem>>, vector<1x32xf32>
    %79 = vector.broadcast %78 : vector<1x32xf32> to vector<16x32xf32>
    %80 = arith.addf %77, %79 : vector<16x32xf32>
    %81 = arith.addf %66, %80 : vector<16x32xf32>
    %cst_44 = arith.constant dense<0.000000e+00> : vector<16xf32>
    %82 = vector.multi_reduction <add>, %81, %cst_44 [1] : vector<16x32xf32> to vector<16xf32>
    %83 = vector.shape_cast %82 : vector<16xf32> to vector<16x1xf32>
    %cst_45 = arith.constant 3.200000e+01 : f32
    %84 = vector.broadcast %cst_45 : f32 to vector<16x1xf32>
    %85 = arith.divf %83, %84 : vector<16x1xf32>
    %86 = vector.broadcast %85 : vector<16x1xf32> to vector<16x32xf32>
    %87 = arith.subf %81, %86 : vector<16x32xf32>
    %88 = arith.mulf %87, %87 : vector<16x32xf32>
    %cst_46 = arith.constant dense<0.000000e+00> : vector<16xf32>
    %89 = vector.multi_reduction <add>, %88, %cst_46 [1] : vector<16x32xf32> to vector<16xf32>
    %90 = vector.shape_cast %89 : vector<16xf32> to vector<16x1xf32>
    %cst_47 = arith.constant 3.200000e+01 : f32
    %91 = vector.broadcast %cst_47 : f32 to vector<16x1xf32>
    %92 = arith.divf %90, %91 : vector<16x1xf32>
    %93 = vector.broadcast %85 : vector<16x1xf32> to vector<16x32xf32>
    %94 = arith.subf %81, %93 : vector<16x32xf32>
    %cst_48 = arith.constant 9.99999974E-6 : f32
    %95 = vector.broadcast %cst_48 : f32 to vector<16x1xf32>
    %96 = arith.addf %92, %95 : vector<16x1xf32>
    %97 = math.rsqrt %96 : vector<16x1xf32>
    %98 = vector.broadcast %97 : vector<16x1xf32> to vector<16x32xf32>
    %99 = arith.mulf %94, %98 : vector<16x32xf32>
    %c0_49 = arith.constant 0 : index
    %c0_50 = arith.constant 0 : index
    %100 = vector.load %arg19[%c0_49, %c0_50] : memref<1x32xf32, #tpu.memory_space<vmem>>, vector<1x32xf32>
    %101 = vector.broadcast %100 : vector<1x32xf32> to vector<16x32xf32>
    %102 = arith.mulf %99, %101 : vector<16x32xf32>
    %c0_51 = arith.constant 0 : index
    %c0_52 = arith.constant 0 : index
    %103 = vector.load %arg20[%c0_51, %c0_52] : memref<1x32xf32, #tpu.memory_space<vmem>>, vector<1x32xf32>
    %104 = vector.broadcast %103 : vector<1x32xf32> to vector<16x32xf32>
    %105 = arith.addf %102, %104 : vector<16x32xf32>
    %106 = arith.truncf %105 : vector<16x32xf32> to vector<16x32xbf16>
    %c0_53 = arith.constant 0 : index
    %c0_54 = arith.constant 0 : index
    %c0_55 = arith.constant 0 : index
    %107 = vector.load %arg21[%c0_53, %c0_54, %c0_55] : memref<1x16x32xbf16, #tpu.memory_space<vmem>>, vector<1x16x32xbf16>
    %108 = vector.shape_cast %107 : vector<1x16x32xbf16> to vector<16x32xbf16>
    %109 = vector.shape_cast %106 : vector<16x32xbf16> to vector<1x16x32xbf16>
    tpu.vector_store %arg21[%c0_53, %c0_54, %c0_55], %109 {strides = array<i32>} : memref<1x16x32xbf16, #tpu.memory_space<vmem>>, vector<1x16x32xbf16>,
    return
  }
  func.func @transform_0(%arg0: i32, %arg1: i32) -> (i32, i32, i32) {
    %c0_i32 = arith.constant 0 : i32
    %c0_i32_0 = arith.constant 0 : i32
    %c0_i32_1 = arith.constant 0 : i32
    return %arg0, %c0_i32, %c0_i32_0 : i32, i32, i32
  }
  func.func @transform_1(%arg0: i32, %arg1: i32) -> (i32, i32, i32) {
    %c0_i32 = arith.constant 0 : i32
    %c0_i32_0 = arith.constant 0 : i32
    %c0_i32_1 = arith.constant 0 : i32
    return %arg0, %c0_i32, %c0_i32_0 : i32, i32, i32
  }
  func.func @transform_2(%arg0: i32, %arg1: i32) -> (i32, i32, i32) {
    %c0_i32 = arith.constant 0 : i32
    %c0_i32_0 = arith.constant 0 : i32
    %c0_i32_1 = arith.constant 0 : i32
    return %arg0, %c0_i32, %c0_i32_0 : i32, i32, i32
  }
  func.func @transform_3(%arg0: i32, %arg1: i32) -> (i32, i32) {
    %c0_i32 = arith.constant 0 : i32
    %c0_i32_0 = arith.constant 0 : i32
    %c0_i32_1 = arith.constant 0 : i32
    return %c0_i32, %c0_i32_0 : i32, i32
  }
  func.func @transform_4(%arg0: i32, %arg1: i32) -> (i32, i32) {
    %c0_i32 = arith.constant 0 : i32
    %c0_i32_0 = arith.constant 0 : i32
    %c0_i32_1 = arith.constant 0 : i32
    return %c0_i32, %c0_i32_0 : i32, i32
  }
  func.func @transform_5(%arg0: i32, %arg1: i32) -> (i32, i32) {
    %c0_i32 = arith.constant 0 : i32
    %c0_i32_0 = arith.constant 0 : i32
    %c0_i32_1 = arith.constant 0 : i32
    return %c0_i32, %c0_i32_0 : i32, i32
  }
  func.func @transform_6(%arg0: i32, %arg1: i32) -> (i32, i32) {
    %c0_i32 = arith.constant 0 : i32
    %c0_i32_0 = arith.constant 0 : i32
    %c0_i32_1 = arith.constant 0 : i32
    return %c0_i32, %c0_i32_0 : i32, i32
  }
  func.func @transform_7(%arg0: i32, %arg1: i32) -> (i32, i32) {
    %c0_i32 = arith.constant 0 : i32
    %c0_i32_0 = arith.constant 0 : i32
    %c0_i32_1 = arith.constant 0 : i32
    return %c0_i32, %c0_i32_0 : i32, i32
  }
  func.func @transform_8(%arg0: i32, %arg1: i32) -> (i32, i32) {
    %c0_i32 = arith.constant 0 : i32
    %c0_i32_0 = arith.constant 0 : i32
    %c0_i32_1 = arith.constant 0 : i32
    return %c0_i32, %c0_i32_0 : i32, i32
  }
  func.func @transform_9(%arg0: i32, %arg1: i32) -> (i32, i32) {
    %c0_i32 = arith.constant 0 : i32
    %c0_i32_0 = arith.constant 0 : i32
    %c0_i32_1 = arith.constant 0 : i32
    return %c0_i32, %c0_i32_0 : i32, i32
  }
  func.func @transform_10(%arg0: i32, %arg1: i32) -> (i32, i32) {
    %c0_i32 = arith.constant 0 : i32
    %c0_i32_0 = arith.constant 0 : i32
    %c0_i32_1 = arith.constant 0 : i32
    return %c0_i32, %c0_i32_0 : i32, i32
  }
  func.func @transform_11(%arg0: i32, %arg1: i32) -> (i32, i32) {
    %c0_i32 = arith.constant 0 : i32
    %c0_i32_0 = arith.constant 0 : i32
    %c0_i32_1 = arith.constant 0 : i32
    return %c0_i32, %c0_i32_0 : i32, i32
  }
  func.func @transform_12(%arg0: i32, %arg1: i32) -> (i32, i32) {
    %c0_i32 = arith.constant 0 : i32
    %c0_i32_0 = arith.constant 0 : i32
    %c0_i32_1 = arith.constant 0 : i32
    return %c0_i32, %c0_i32_0 : i32, i32
  }
  func.func @transform_13(%arg0: i32, %arg1: i32) -> (i32, i32) {
    %c0_i32 = arith.constant 0 : i32
    %c0_i32_0 = arith.constant 0 : i32
    %c0_i32_1 = arith.constant 0 : i32
    return %c0_i32, %c0_i32_0 : i32, i32
  }
  func.func @transform_14(%arg0: i32, %arg1: i32) -> (i32, i32) {
    %c0_i32 = arith.constant 0 : i32
    %c0_i32_0 = arith.constant 0 : i32
    %c0_i32_1 = arith.constant 0 : i32
    return %c0_i32, %c0_i32_0 : i32, i32
  }
  func.func @transform_15(%arg0: i32, %arg1: i32) -> (i32, i32) {
    %c0_i32 = arith.constant 0 : i32
    %c0_i32_0 = arith.constant 0 : i32
    %c0_i32_1 = arith.constant 0 : i32
    return %c0_i32, %c0_i32_0 : i32, i32
  }
  func.func @transform_16(%arg0: i32, %arg1: i32) -> (i32, i32) {
    %c0_i32 = arith.constant 0 : i32
    %c0_i32_0 = arith.constant 0 : i32
    %c0_i32_1 = arith.constant 0 : i32
    return %c0_i32, %c0_i32_0 : i32, i32
  }
  func.func @transform_17(%arg0: i32, %arg1: i32) -> (i32, i32) {
    %c0_i32 = arith.constant 0 : i32
    %c0_i32_0 = arith.constant 0 : i32
    %c0_i32_1 = arith.constant 0 : i32
    return %c0_i32, %c0_i32_0 : i32, i32
  }
  func.func @transform_18(%arg0: i32, %arg1: i32) -> (i32, i32) {
    %c0_i32 = arith.constant 0 : i32
    %c0_i32_0 = arith.constant 0 : i32
    %c0_i32_1 = arith.constant 0 : i32
    return %c0_i32, %c0_i32_0 : i32, i32
  }
  func.func @transform_19(%arg0: i32, %arg1: i32) -> (i32, i32, i32) {
    %c0_i32 = arith.constant 0 : i32
    %c0_i32_0 = arith.constant 0 : i32
    return %arg0, %arg1, %c0_i32 : i32, i32, i32
  }
}

</mosaic_0001>

<bundles_post_ra>
// kernel: tpu_custom_call.1
= control target key start
LH: loop header
LB: loop body
LE: loop exit
PB: predicated region body
PF: predicated region fallthrough
CT: control target
= control target key end

     0   :  { %s3217_s0 = inlined_call_operand.hbm [shape: f32[2,32,32], index: 0, kind: input, shape index: {}]   ;;  %s3218_s1 = inlined_call_operand.vmem [shape: bf16[2,32,32], index: 1, kind: input, shape index: {}]   ;;  %s3219_s2 = inlined_call_operand.hbm [shape: f32[2,1,32], index: 2, kind: input, shape index: {}]   ;;  %s3220_s3 = inlined_call_operand.vmem [shape: bf16[32,32], index: 3, kind: input, shape index: {}]   ;;  %s3221_s4 = inlined_call_operand.vmem [shape: f32[1,32], index: 4, kind: input, shape index: {}]   ;;  %s3222_s5 = inlined_call_operand.hbm [shape: bf16[32,32], index: 5, kind: input, shape index: {}]   ;;  %s3223_s6 = inlined_call_operand.hbm [shape: f32[1,32], index: 6, kind: input, shape index: {}]   ;;  %s3224_s7 = inlined_call_operand.hbm [shape: bf16[32,32], index: 7, kind: input, shape index: {}]   ;;  %s3225_s8 = inlined_call_operand.hbm [shape: f32[1,32], index: 8, kind: input, shape index: {}]   ;;  %s3226_s9 = inlined_call_operand.vmem [shape: bf16[32,32], index: 9, kind: input, shape index: {}]   ;;  %s3227_s10 = inlined_call_operand.hbm [shape: f32[1,32], index: 10, kind: input, shape index: {}]   ;;  %s3228_s11 = inlined_call_operand.hbm [shape: f32[1,32], index: 11, kind: input, shape index: {}]   ;;  %s3229_s12 = inlined_call_operand.hbm [shape: f32[1,32], index: 12, kind: input, shape index: {}]   ;;  %s3230_s13 = inlined_call_operand.vmem [shape: bf16[32,64], index: 13, kind: input, shape index: {}]   ;;  %s3231_s14 = inlined_call_operand.vmem [shape: f32[1,64], index: 14, kind: input, shape index: {}]   ;;  %s3232_s15 = inlined_call_operand.vmem [shape: bf16[64,32], index: 15, kind: input, shape index: {}]   ;;  %s3233_s16 = inlined_call_operand.vmem [shape: f32[1,32], index: 16, kind: input, shape index: {}]   ;;  %s3234_s17 = inlined_call_operand.vmem [shape: f32[1,32], index: 17, kind: input, shape index: {}]   ;;  %s3235_s18 = inlined_call_operand.vmem [shape: f32[1,32], index: 18, kind: input, shape index: {}]   ;;  %s3236_s19 = inlined_call_operand.hbm [shape: bf16[2,32,32], index: 19, kind: output, shape index: {}]  }
   0x1   :  { %3256 = sst [smem:[#allocation32_spill]] %s3217_s0 }
   0x2   :  { %3257 = sst [smem:[#allocation33_spill]] %s3218_s1 }
   0x3   :  { %3258 = sst [smem:[#allocation34_spill]] %s3219_s2 }
   0x4   :  { %3259 = sst [smem:[#allocation35_spill]] %s3220_s3 }
   0x5   :  { %3260 = sst [smem:[#allocation36_spill]] %s3221_s4 }
   0x6   :  { %3261 = sst [smem:[#allocation37_spill]] %s3222_s5 }
   0x7   :  { %3262 = sst [smem:[#allocation38_spill]] %s3223_s6 }
   0x8   :  { %3263 = sst [smem:[#allocation39_spill]] %s3224_s7 }
   0x9   :  { %3264 = sst [smem:[#allocation40_spill]] %s3225_s8 }
   0xa   :  { %3265 = sst [smem:[#allocation41_spill]] %s3226_s9 }
   0xb   :  { %3266 = sst [smem:[#allocation42_spill]] %s3227_s10 }
   0xc   :  { %3267 = sst [smem:[#allocation43_spill]] %s3228_s11 }
   0xd   :  { %3268 = sst [smem:[#allocation44_spill]] %s3229_s12 }
   0xe   :  { %3269 = sst [smem:[#allocation45_spill]] %s3230_s13 }
   0xf   :  { %3270 = sst [smem:[#allocation46_spill]] %s3231_s14 }
  0x10   :  { %3271 = sst [smem:[#allocation47_spill]] %s3232_s15 }
  0x11   :  { %3272 = sst [smem:[#allocation48_spill]] %s3233_s16 }
  0x12   :  { %3273 = sst [smem:[#allocation49_spill]] %s3234_s17 }
  0x13   :  { %3274 = sst [smem:[#allocation50_spill]] %s3235_s18 }
  0x14   :  { %3275 = sst [smem:[#allocation51_spill]] %s3236_s19 }
  0x15   :  { %24 = vsyncpa [#allocation5], 0 }
  0x16   :  { %26 = vsyncpa [#allocation5 + $0x1], 0 }
  0x17   :  { %27 = vsyncpa [#allocation8], 0 }
  0x18   :  { %29 = vsyncpa [#allocation8 + $0x1], 0 }
  0x19   :  { %30 = vsyncpa [#allocation11], 0 }
  0x1a   :  { %31 = vsyncpa [#allocation14], 0 }
  0x1b   :  { %32 = vsyncpa [#allocation17], 0 }
  0x1c   :  { %33 = vsyncpa [#allocation6], 0 }
  0x1d   :  { %35 = vsyncpa [#allocation6 + $0x1], 0  ;;  %s2628_s0 = smov 0   ;;  %s2630_s30 = smov 0  }
  0x1e   :  { %s2632_s20 = smov 0   ;;  %s2634_s21 = smov 0  }
  0x1f   :  { %s2636_s1 = smov 0   ;;  %s2638_s22 = smov 0  }
  0x20   :  { %s2640_s2 = smov 0   ;;  %s2642_s23 = smov 0  }
  0x21   :  { %s2644_s24 = smov 0   ;;  %s2646_s25 = smov 0  }
  0x22   :  { %s2648_s3 = smov 0  }
  0x23 LB: > { %3276 = sst [smem:[#allocation27_spill]] %s2468_s0  ;;  %s2684_s26 = sadd.s32 4294967295, %s2508_s3   ;;  %s2508_s3 = sphi %s2648_s3, %s41_s3   ;;  %s2504_s25 = sphi %s2646_s25, %s3347_s25   ;;  %s2500_s24 = sphi %s2644_s24, %s3346_s24   ;;  %s2496_s23 = sphi %s2642_s23, %s3345_s23   ;;  %s2492_s2 = sphi %s2640_s2, %s3344_s2   ;;  %s2488_s22 = sphi %s2638_s22, %s3343_s22   ;;  %s2484_s1 = sphi %s2636_s1, %s3342_s1   ;;  %s2480_s21 = sphi %s2634_s21, %s3341_s21   ;;  %s2476_s20 = sphi %s2632_s20, %s3340_s20   ;;  %s2472_s30 = sphi %s2630_s30, %s3339_s30   ;;  %s2468_s0 = sphi %s2628_s0, %s3338_s0  }
  0x24   : > { %3277 = sst [smem:[#allocation28_spill]] %s2472_s30  ;;  %p1717_p0 = scmp.ge.s32.totalorder %s2508_s3, 1 }
  0x25   : > { %3278 = sst [smem:[#allocation29_spill]] %s2492_s2  ;;  %p3249_p1 = scmp.eq.s32.totalorder %s2684_s26, 0 }
  0x26   : > { %3279 = sst [smem:[#allocation30_spill]] %s2496_s23  ;;  %p500_p2 = scmp.lt.s32.totalorder %s2508_s3, 5 }
  0x27   : > { %s2510_s28 = smov [#allocation9]   ;;  %s2511_s18 = smov [#allocation10]  }
  0x28   : > { %p2689_p3 = pnand %p1717_p0, %p500_p2  ;;  %s518_s29 = sshll.u32 %s2510_s28, 4  ;;  %s2693_s29 = int_to_ptr.vmem [resolvable:$true] %s518_s29 }
  0x29   : > { %s532_s17 = sshll.u32 %s2511_s18, 4  ;;  %s2512_s16 = smov [#allocation13]   ;;  %s2703_s17 = int_to_ptr.vmem [resolvable:$true] %s532_s17 }
  0x2a   : > { %s3280_s27 = scalar_select %p2689_p3, 1, 0 }
  0x2b   : > { %p1925_p4 = pneg %p2689_p3  ;;  %s2705_s14 = sshll.u32 %s2512_s16, 4  ;;  %s557_s14 = int_to_ptr.vmem [resolvable:$true] %s2705_s14 }
  0x2c   : > { %3281 = sst [smem:[#allocation31_spill]] %s3280_s27  ;;  %s3283_s5 = sld [smem:[#allocation37_spill]] }
  0x2d   : > { %p2699_p5 = pnand %p1925_p4, %p3249_p1 }
  0x2f   : > { %p2715_p7 = pneg %p2699_p5 }
  0x32   : > { %s2110_s28 = scalar_lea.hbm %s3283_s5, 256 }
  0x33   : > { %p2111_p6 = scmp.ne.s32.totalorder %s3283_s5, %s2110_s28  ;;  %p2117_p10 = scmp.lt.u32.totalorder %s2110_s28, %s3283_s5 }
  0x35   : > { %p2113_p8 = pnand %p2715_p7, %p2111_p6 }
  0x37   : > { %p2114_p9 = pneg %p2113_p8 }
  0x39   : > { %p2119_p11 = pnand %p2117_p10, %p2114_p9 }
  0x3b   : > { %2122 = shalt.err (!%p2119_p11)
}
  0x3c   : > { %s2123_s4 = scalar_lea.vmem %s2693_s29, 256  ;;  %p2131_p2 = scmp.lt.s32.totalorder %s2693_s29, %s2693_s29 }
  0x3d   : > { %p2124_p12 = scmp.ne.s32.totalorder %s2693_s29, %s2123_s4  ;;  %p2132_p4 = scmp.lt.s32.totalorder %s2123_s4, %s2123_s4 }
  0x3f   : > { %p2126_p13 = pnand %p2124_p12, %p2715_p7  ;;  %p2133_p6 = por %p2132_p4, %p2131_p2 }
  0x41   : > { %p2127_p0 = pneg %p2126_p13 }
  0x43   : > { %p2134_p8 = pnand %p2133_p6, %p2127_p0 }
  0x45   : > { %2137 = shalt.err (!%p2134_p8)
}
  0x46   : > { %s3251_s9 = smov 64   ;;  %s2514_s13 = smov 4  }
  0x47   : > { %1928 = dma.hbm_to_vmem [thread:$0]  (!%p2699_p5), %s3283_s5, 256, %s2693_s29, [#allocation8], %s3251_s9, %s3251_s9, %s2514_s13  }
  0x48   : > { %s3285_s6 = sld [smem:[#allocation38_spill]] }
  0x4e   : > { %s2138_s4 = scalar_lea.hbm %s3285_s6, 16 }
  0x4f   : > { %p2139_p9 = scmp.ne.s32.totalorder %s3285_s6, %s2138_s4  ;;  %p2145_p12 = scmp.lt.u32.totalorder %s2138_s4, %s3285_s6 }
  0x51   : > { %p2141_p10 = pnand %p2139_p9, %p2715_p7 }
  0x53   : > { %p2142_p11 = pneg %p2141_p10 }
  0x55   : > { %p2147_p13 = pnand %p2145_p12, %p2142_p11 }
  0x57   : > { %2150 = shalt.err (!%p2147_p13)
}
  0x58   : > { %s2151_s29 = scalar_lea.vmem %s2703_s17, 16  ;;  %s2158_s23 = scalar_lea.vmem %s2703_s17, 32 }
  0x59   : > { %p2152_p0 = scmp.ne.s32.totalorder %s2703_s17, %s2151_s29  ;;  %p2159_p6 = scmp.lt.s32.totalorder %s2703_s17, %s2703_s17 }
  0x5a   : > { %p2160_p8 = scmp.lt.s32.totalorder %s2158_s23, %s2151_s29 }
  0x5b   : > { %p2154_p2 = pnand %p2152_p0, %p2715_p7 }
  0x5c   : > { %p2161_p9 = por %p2160_p8, %p2159_p6 }
  0x5d   : > { %p2155_p4 = pneg %p2154_p2 }
  0x5f   : > { %p2162_p10 = pnand %p2161_p9, %p2155_p4 }
  0x61   : > { %2165 = shalt.err (!%p2162_p10)
}
  0x62   : > { %1931 = dma.hbm_to_vmem [thread:$0]  (!%p2699_p5), %s3285_s6, 16, %s2703_s17, [#allocation11]  }
  0x63   : > { %s3286_s8 = sld [smem:[#allocation40_spill]] }
  0x69   : > { %s2166_s28 = scalar_lea.hbm %s3286_s8, 16 }
  0x6a   : > { %p2167_p11 = scmp.ne.s32.totalorder %s3286_s8, %s2166_s28  ;;  %p2173_p0 = scmp.lt.u32.totalorder %s2166_s28, %s3286_s8 }
  0x6c   : > { %p2169_p12 = pnand %p2167_p11, %p2715_p7 }
  0x6e   : > { %p2170_p13 = pneg %p2169_p12 }
  0x70   : > { %p2175_p2 = pnand %p2173_p0, %p2170_p13 }
  0x72   : > { %2178 = shalt.err (!%p2175_p2)
}
  0x73   : > { %s2179_s23 = scalar_lea.vmem %s557_s14, 16  ;;  %s2186_s17 = scalar_lea.vmem %s557_s14, 32 }
  0x74   : > { %p2180_p4 = scmp.ne.s32.totalorder %s557_s14, %s2179_s23  ;;  %p2187_p9 = scmp.lt.s32.totalorder %s557_s14, %s557_s14 }
  0x75   : > { %p2188_p10 = scmp.lt.s32.totalorder %s2186_s17, %s2179_s23 }
  0x76   : > { %p2182_p6 = pnand %p2180_p4, %p2715_p7 }
  0x77   : > { %p2189_p1 = por %p2188_p10, %p2187_p9 }
  0x78   : > { %p2183_p8 = pneg %p2182_p6 }
  0x7a   : > { %p2190_p3 = pnand %p2189_p1, %p2183_p8 }
  0x7c   : > { %2193 = shalt.err (!%p2190_p3)
}
  0x7d   : > { %1937 = dma.hbm_to_vmem [thread:$0]  (!%p2699_p5), %s3286_s8, 16, %s557_s14, [#allocation14]  }
  0x7e   : > { %s2515_s27 = smov [#allocation16]   ;;  %s2516_s28 = smov [#allocation12]  }
  0x7f   : > { %s581_s15 = sshll.u32 %s2515_s27, 4  ;;  %s542_s18 = sshll.u32 %s2516_s28, 4  ;;  %s582_s15 = int_to_ptr.vmem [resolvable:$true] %s581_s15  ;;  %s543_s18 = int_to_ptr.vmem [resolvable:$true] %s542_s18 }
  0x80   : > { %s3287_s11 = sld [smem:[#allocation43_spill]] }
  0x86   : > { %s2194_s29 = scalar_lea.hbm %s3287_s11, 16 }
  0x87   : > { %p2195_p1 = scmp.ne.s32.totalorder %s3287_s11, %s2194_s29  ;;  %p2201_p12 = scmp.lt.u32.totalorder %s2194_s29, %s3287_s11 }
  0x89   : > { %p2197_p3 = pnand %p2195_p1, %p2715_p7 }
  0x8b   : > { %p2198_p11 = pneg %p2197_p3 }
  0x8d   : > { %p2203_p13 = pnand %p2201_p12, %p2198_p11 }
  0x8f   : > { %2206 = shalt.err (!%p2203_p13)
}
  0x90   : > { %s2207_s14 = scalar_lea.vmem %s582_s15, 16  ;;  %s2214_s30 = scalar_lea.vmem %s582_s15, 32 }
  0x91   : > { %p2208_p0 = scmp.ne.s32.totalorder %s582_s15, %s2207_s14  ;;  %p2215_p6 = scmp.lt.s32.totalorder %s582_s15, %s582_s15 }
  0x92   : > { %p2216_p8 = scmp.lt.s32.totalorder %s2214_s30, %s2207_s14 }
  0x93   : > { %p2210_p2 = pnand %p2208_p0, %p2715_p7 }
  0x94   : > { %p2217_p9 = por %p2216_p8, %p2215_p6 }
  0x95   : > { %p2211_p4 = pneg %p2210_p2 }
  0x97   : > { %p2218_p10 = pnand %p2217_p9, %p2211_p4 }
  0x99   : > { %2221 = shalt.err (!%p2218_p10)
}
  0x9a   : > { %1943 = dma.hbm_to_vmem [thread:$0]  (!%p2699_p5), %s3287_s11, 16, %s582_s15, [#allocation17]  }
  0x9b   : > { %s3288_s7 = sld [smem:[#allocation39_spill]] }
  0xa1   : > { %s2222_s4 = scalar_lea.hbm %s3288_s7, 256 }
  0xa2   : > { %p2223_p1 = scmp.ne.s32.totalorder %s3288_s7, %s2222_s4  ;;  %p2229_p12 = scmp.lt.u32.totalorder %s2222_s4, %s3288_s7 }
  0xa4   : > { %p2225_p3 = pnand %p2223_p1, %p2715_p7 }
  0xa6   : > { %p2226_p11 = pneg %p2225_p3 }
  0xa8   : > { %p2231_p13 = pnand %p2229_p12, %p2226_p11 }
  0xaa   : > { %2234 = shalt.err (!%p2231_p13)
}
  0xab   : > { %s2235_s14 = scalar_lea.vmem %s543_s18, 256  ;;  %p2243_p6 = scmp.lt.s32.totalorder %s543_s18, %s543_s18 }
  0xac   : > { %p2236_p0 = scmp.ne.s32.totalorder %s543_s18, %s2235_s14  ;;  %p2244_p8 = scmp.lt.s32.totalorder %s2235_s14, %s2235_s14 }
  0xae   : > { %p2238_p2 = pnand %p2236_p0, %p2715_p7  ;;  %p2245_p9 = por %p2244_p8, %p2243_p6 }
  0xb0   : > { %p2239_p4 = pneg %p2238_p2 }
  0xb2   : > { %p2246_p10 = pnand %p2245_p9, %p2239_p4 }
  0xb4   : > { %2249 = shalt.err (!%p2246_p10)
}
  0xb5   : > { %s3289_s15 = smov 64   ;;  %s2517_s28 = smov [#allocation15]  }
  0xb6   : > { %1934 = dma.hbm_to_vmem [thread:$0]  (!%p2699_p5), %s3288_s7, 256, %s543_s18, [#allocation11], %s3289_s15, %s3289_s15, %s2514_s13  }
  0xb7   : > { %s570_s9 = sshll.u32 %s2517_s28, 4  ;;  %s2518_s16 = smov [#allocation18]   ;;  %s571_s9 = int_to_ptr.vmem [resolvable:$true] %s570_s9 }
  0xb8   : > { %s592_s4 = sshll.u32 %s2518_s16, 4  ;;  %s3290_s10 = sld [smem:[#allocation42_spill]]  ;;  %s593_s4 = int_to_ptr.vmem [resolvable:$true] %s592_s4 }
  0xbe   : > { %s2250_s17 = scalar_lea.hbm %s3290_s10, 16 }
  0xbf   : > { %p2251_p1 = scmp.ne.s32.totalorder %s3290_s10, %s2250_s17  ;;  %p2257_p12 = scmp.lt.u32.totalorder %s2250_s17, %s3290_s10 }
  0xc1   : > { %p2253_p3 = pnand %p2251_p1, %p2715_p7 }
  0xc3   : > { %p2254_p11 = pneg %p2253_p3 }
  0xc5   : > { %p2259_p13 = pnand %p2257_p12, %p2254_p11 }
  0xc7   : > { %2262 = shalt.err (!%p2259_p13)
}
  0xc8   : > { %s2263_s13 = scalar_lea.vmem %s571_s9, 16  ;;  %s2270_s18 = scalar_lea.vmem %s571_s9, 32 }
  0xc9   : > { %p2264_p0 = scmp.ne.s32.totalorder %s571_s9, %s2263_s13  ;;  %p2271_p6 = scmp.lt.s32.totalorder %s571_s9, %s571_s9 }
  0xca   : > { %p2272_p8 = scmp.lt.s32.totalorder %s2270_s18, %s2263_s13 }
  0xcb   : > { %p2266_p2 = pnand %p2264_p0, %p2715_p7 }
  0xcc   : > { %p2273_p9 = por %p2272_p8, %p2271_p6 }
  0xcd   : > { %p2267_p4 = pneg %p2266_p2 }
  0xcf   : > { %p2274_p10 = pnand %p2273_p9, %p2267_p4 }
  0xd1   : > { %2277 = shalt.err (!%p2274_p10)
}
  0xd2   : > { %1940 = dma.hbm_to_vmem [thread:$0]  (!%p2699_p5), %s3290_s10, 16, %s571_s9, [#allocation14]  }
  0xd3   : > { %s3291_s12 = sld [smem:[#allocation44_spill]] }
  0xd9   : > { %s2278_s16 = scalar_lea.hbm %s3291_s12, 16 }
  0xda   : > { %p2279_p1 = scmp.ne.s32.totalorder %s3291_s12, %s2278_s16  ;;  %p2285_p12 = scmp.lt.u32.totalorder %s2278_s16, %s3291_s12 }
  0xdc   : > { %p2281_p3 = pnand %p2279_p1, %p2715_p7 }
  0xde   : > { %p2282_p11 = pneg %p2281_p3 }
  0xe0   : > { %p2287_p13 = pnand %p2285_p12, %p2282_p11 }
  0xe2   : > { %2290 = shalt.err (!%p2287_p13)
}
  0xe3   : > { %s2291_s14 = scalar_lea.vmem %s593_s4, 16  ;;  %s2298_s9 = scalar_lea.vmem %s593_s4, 32 }
  0xe4   : > { %p2292_p0 = scmp.ne.s32.totalorder %s593_s4, %s2291_s14  ;;  %p2299_p6 = scmp.lt.s32.totalorder %s593_s4, %s593_s4 }
  0xe5   : > { %p2300_p8 = scmp.lt.s32.totalorder %s2298_s9, %s2291_s14 }
  0xe6   : > { %p2294_p2 = pnand %p2292_p0, %p2715_p7 }
  0xe7   : > { %p2301_p9 = por %p2300_p8, %p2299_p6 }
  0xe8   : > { %p2295_p4 = pneg %p2294_p2 }
  0xea   : > { %p2302_p10 = pnand %p2301_p9, %p2295_p4 }
  0xec   : > { %2305 = shalt.err (!%p2302_p10)
}
  0xed   : > { %1946 = dma.hbm_to_vmem [thread:$0]  (!%p2699_p5), %s3291_s12, 16, %s593_s4, [#allocation17]  }
  0xee   : > { %s1716_s2 = sadd.s32 4294967294, %s2508_s3   ;;  %s3292_s18 = sld [smem:[#allocation28_spill]] }
  0xef   : > { %s50_s19 = sadd.s32 1, %s2500_s24  ;;  %s53_s15 = sadd.s32 1, %s2504_s25 }
  0xf0   : > { %p51_p7 = scmp.ge.s32.totalorder %s50_s19, 2  ;;  %s3293_s27 = sld [smem:[#allocation27_spill]] }
  0xf1   : > { %s60_s5 = sadd.s32 1, %s2488_s22  ;;  %p67_p1 = scmp.ne.s32.totalorder %s2488_s22, %s2484_s1 }
  0xf2   : > { %p68_p3 = scmp.eq.s32.totalorder %s2508_s3, 0  ;;  %s3349_s19 = smov (%p51_p7, %s50_s19), 0 }
  0xf3   : > { %s3351_s15 = smov (!%p51_p7, %s53_s15), %s2504_s25  ;;  %p73_p5 = scmp.ne.s32.totalorder %s2484_s1, %s2480_s21 }
  0xf4   : > { %p2867_p11 = por %p68_p3, %p67_p1  ;;  %p55_p12 = scmp.ge.s32.totalorder %s3351_s15, 2 }
  0xf5   : > { %s472_s28 = ssub.s32 %s2500_s24, %s3349_s19  ;;  %p3295_p13 = scmp.eq.s32.totalorder %s2684_s26, 0 }
  0xf6   : > { %s476_s29 = sadd.s32 1, %s2476_s20  ;;  %s3353_s15 = smov (%p55_p12, %s3351_s15), 0 }
  0xf7   : > { %p2877_p0 = por %p3295_p13, %p73_p5  ;;  %p486_p2 = scmp.ne.s32.totalorder %s2476_s20, %s3292_s18 }
  0xf8   : > { %p487_p4 = scmp.eq.s32.totalorder %s2684_s26, 3  ;;  %s57_s23 = ssub.s32 %s2504_s25, %s3353_s15 }
  0xf9   : > { %s3296_s16 = scalar_select %p2877_p0, 1, 0 }
  0xfa   : > { %p492_p6 = scmp.ne.s32.totalorder %s3292_s18, %s3293_s27  ;;  %p58_p8 = scmp.eq.s32.totalorder %s57_s23, 0 }
  0xfb   : > { %s473_s21 = sor.u32 %s472_s28, %s57_s23  ;;  %p2891_p10 = por %p487_p4, %p486_p2 }
  0xfc   : > { %p474_p9 = scmp.eq.s32.totalorder %s473_s21, 0  ;;  %p493_p7 = scmp.eq.s32.totalorder %s1716_s2, 3 }
  0xfd   : > { %s3297_s17 = scalar_select %p2891_p10, 1, 0 }
  0xfe   : > { %s2896_s0 = scalar_select %p58_p8, %s2488_s22, %s60_s5  }
  0xff   : > { %s2899_s14 = scalar_select %p474_p9, %s2476_s20, %s476_s29  }
 0x100   : > { %p1965_p1 = scmp.lt.s32.totalorder %s2508_s3, 4  ;;  %s2903_s9 = sand.u32 1, %s2488_s22  }
 0x101   : > { %s1791_s30 = sshll.u32 %s2504_s25, 9  ;;  %p2906_p3 = por %p493_p7, %p492_p6 }
 0x102   : > { %s1726_s18 = sshll.u32 %s2903_s9, 5  ;;  %s3299_s23 = sld [smem:[#allocation32_spill]] }
 0x103   : > { %s3298_s13 = scalar_select %p2906_p3, 1, 0 }
 0x104   : > { %p2918_p5 = pnand %p1965_p1, %p2867_p11  ;;  %s625_s5 = scalar_lea.vmem [#allocation4], %s1726_s18 }
 0x105   : > { %s632_s29 = sshll.u32 %s625_s5, 4  ;;  %s622_s8 = scalar_lea.sflag [#allocation5], %s2903_s9  ;;  %s2922_s29 = int_to_ptr.vmem [resolvable:$true] %s632_s29 }
 0x106   : > { %p2308_p13 = pneg %p2918_p5 }
 0x108   : > { %s3300_s6 = smov %s3299_s23  ;;  %s2914_s21 = scalar_lea.hbm %s3299_s23, %s1791_s30 }
 0x109   : > { %s2306_s27 = scalar_lea.hbm %s2914_s21, 512  ;;  %s2311_s28 = scalar_lea.hbm %s3300_s6, 1024 }
 0x10a   : > { %p2307_p12 = scmp.ne.s32.totalorder %s2914_s21, %s2306_s27  ;;  %p2312_p11 = scmp.lt.u32.totalorder %s2914_s21, %s3300_s6 }
 0x10b   : > { %p2313_p6 = scmp.lt.u32.totalorder %s2311_s28, %s2306_s27  ;;  %p2315_p9 = scmp.lt.u32.totalorder %s2306_s27, %s2914_s21 }
 0x10c   : > { %p2309_p2 = pnand %p2308_p13, %p2307_p12 }
 0x10d   : > { %p2314_p8 = por %p2313_p6, %p2312_p11 }
 0x10e   : > { %p2310_p4 = pneg %p2309_p2 }
 0x10f   : > { %p2316_p7 = por %p2315_p9, %p2314_p8 }
 0x111   : > { %p2317_p1 = pnand %p2316_p7, %p2310_p4 }
 0x113   : > { %2320 = shalt.err (!%p2317_p1)
}
 0x114   : > { %s2321_s18 = scalar_lea.vmem %s2922_s29, 512  ;;  %s2519_s5 = smov [#allocation4]  }
 0x115   : > { %p2322_p12 = scmp.ne.s32.totalorder %s2922_s29, %s2321_s18  ;;  %s2326_s4 = sshll.u32 %s2519_s5, 4  ;;  %s2327_s4 = int_to_ptr.vmem [resolvable:$false] %s2326_s4 }
 0x116   : > { %s2328_s10 = scalar_lea.vmem %s2327_s4, 1024  ;;  %p2329_p10 = scmp.lt.s32.totalorder %s2922_s29, %s2327_s4 }
 0x117   : > { %p2324_p2 = pnand %p2322_p12, %p2308_p13  ;;  %p2330_p11 = scmp.lt.s32.totalorder %s2328_s10, %s2321_s18 }
 0x119   : > { %p2325_p3 = pneg %p2324_p2  ;;  %p2331_p6 = por %p2330_p11, %p2329_p10 }
 0x11b   : > { %p2332_p8 = pnand %p2331_p6, %p2325_p3 }
 0x11d   : > { %2335 = shalt.err (!%p2332_p8)
}
 0x11e   : > { %s2520_s27 = smov 128   ;;  %s2521_s30 = smov 8  }
 0x11f   : > { %1950 = dma.hbm_to_vmem [thread:$0]  (!%p2918_p5), %s2914_s21, 512, %s2922_s29, %s622_s8, %s2520_s27, %s2520_s27, %s2521_s30  }
 0x120   : > { %s1729_s28 = sshll.u32 %s2504_s25, 4  ;;  %s653_s23 = scalar_lea.vmem [#allocation7], %s2903_s9 }
 0x121   : > { %s660_s5 = sshll.u32 %s653_s23, 4  ;;  %s3302_s10 = sld [smem:[#allocation34_spill]]  ;;  %s661_s5 = int_to_ptr.vmem [resolvable:$true] %s660_s5 }
 0x122   : > { %s3303_s6 = sand.u32 1, %s2508_s3  }
 0x123   : > { %s651_s11 = scalar_lea.sflag [#allocation8], %s3303_s6 }
 0x127   : > { %s2958_s7 = scalar_lea.hbm %s3302_s10, %s1729_s28  ;;  %s2341_s21 = scalar_lea.hbm %s3302_s10, 32 }
 0x128   : > { %s2336_s12 = scalar_lea.hbm %s2958_s7, 16  ;;  %p2342_p9 = scmp.lt.u32.totalorder %s2958_s7, %s3302_s10 }
 0x129   : > { %p2337_p10 = scmp.ne.s32.totalorder %s2958_s7, %s2336_s12  ;;  %p2343_p7 = scmp.lt.u32.totalorder %s2341_s21, %s2336_s12 }
 0x12a   : > { %p2345_p12 = scmp.lt.u32.totalorder %s2336_s12, %s2958_s7 }
 0x12b   : > { %p2339_p3 = pnand %p2337_p10, %p2308_p13  ;;  %p2344_p1 = por %p2343_p7, %p2342_p9 }
 0x12d   : > { %p2340_p4 = pneg %p2339_p3  ;;  %p2346_p2 = por %p2345_p12, %p2344_p1 }
 0x12f   : > { %p2347_p11 = pnand %p2346_p2, %p2340_p4 }
 0x131   : > { %2350 = shalt.err (!%p2347_p11)
}
 0x132   : > { %s2351_s6 = scalar_lea.vmem %s661_s5, 16  ;;  %s2522_s30 = smov [#allocation7]  }
 0x133   : > { %p2352_p6 = scmp.ne.s32.totalorder %s661_s5, %s2351_s6  ;;  %s2356_s28 = sshll.u32 %s2522_s30, 4  ;;  %s2357_s28 = int_to_ptr.vmem [resolvable:$false] %s2356_s28 }
 0x134   : > { %s2358_s23 = scalar_lea.vmem %s2357_s28, 32  ;;  %p2359_p3 = scmp.lt.s32.totalorder %s661_s5, %s2357_s28 }
 0x135   : > { %p2354_p8 = pnand %p2352_p6, %p2308_p13  ;;  %p2360_p0 = scmp.lt.s32.totalorder %s2358_s23, %s2351_s6 }
 0x137   : > { %p2355_p10 = pneg %p2354_p8  ;;  %p2361_p7 = por %p2360_p0, %p2359_p3 }
 0x139   : > { %p2362_p9 = pnand %p2361_p7, %p2355_p10 }
 0x13b   : > { %2365 = shalt.err (!%p2362_p9)
}
 0x13c   : > { %1953 = dma.hbm_to_vmem [thread:$0]  (!%p2918_p5), %s2958_s7, 16, %s661_s5, %s651_s11  }
 0x13d   : > { %s3304_s12 = sld [smem:[#allocation31_spill]] }
 0x143   : > { %p3305_p4 = scmp.ne.s32.totalorder %s3304_s12, 0 }
 0x144   : > { %s2984_s18 = sand.u32 (!%p3305_p4), 1, %s2484_s1   ;;  %p3306_p0 = scmp.ne.s32.totalorder (!%p3305_p4), %s3296_s16, 0 }
 0x145   : > { %669 = sbr.rel (%p3305_p4) target bundleno = 2714 (0xa9a), region = 96  ;;  %s1731_s4 = sshll.u32 (!%p3305_p4), %s2984_s18, 5 }
 0x146   : > { %s672_s8 = scalar_lea.sflag (!%p3305_p4), [#allocation5], %s2984_s18  ;;  %s2988_s9 = scalar_lea.vmem (!%p3305_p4), [#allocation4], %s1731_s4 }
 0x14c   : > { %2439 = dma.done.wait (%p3306_p0), %s672_s8, 512  }
 0x14d   : > { %2441 = vsyncadd (%p3306_p0), %s672_s8, 4294966784  ;;  %s680_s7 = sand.u32 1, %s2684_s26   ;;  %s683_s2 = scalar_lea.vmem [#allocation7], %s2984_s18 }
 0x14e   : > { %s681_s11 = scalar_lea.sflag [#allocation8], %s680_s7 }
 0x14f   : > { %2443 = dma.done.wait (%p3306_p0), %s681_s11, 16  }
 0x150   : > { %2445 = vsyncadd (%p3306_p0), %s681_s11, 4294967280  ;;  %p3307_p5 = scmp.eq.s32.totalorder %s2684_s26, 0 }
 0x152   : > { %2447 = dma.done.wait (%p3307_p5), [#allocation8], 256   ;;  %p3308_p13 = pmov %p3307_p5 }
 0x153   : > { %p3309_p1 = pmov %p3307_p5 }
 0x154   : > { %2449 = vsyncadd (%p3308_p13), [#allocation8], 4294967040 }
 0x155   : > { %2451 = dma.done.wait (%p3309_p1), [#allocation11], 272   ;;  %p3310_p12 = pmov %p3309_p1 }
 0x156   : > { %p3311_p2 = pmov %p3309_p1 }
 0x157   : > { %2453 = vsyncadd (%p3310_p12), [#allocation11], 4294967024 }
 0x158   : > { %2455 = dma.done.wait (%p3311_p2), [#allocation14], 32   ;;  %p3312_p11 = pmov %p3309_p1 }
 0x159   : > { %p3313_p6 = pmov %p3309_p1 }
 0x15a   : > { %2457 = vsyncadd (%p3312_p11), [#allocation14], 4294967264 }
 0x15b   : > { %2459 = dma.done.wait (%p3313_p6), [#allocation17], 32   ;;  %p3314_p8 = pmov %p3309_p1 }
 0x15c   : > { %s3315_s16 = sld [smem:[#allocation28_spill]]  ;;  %s3316_s5 = sld [smem:[#allocation30_spill]] }
 0x15d   : > { %2461 = vsyncadd (%p3314_p8), [#allocation17], 4294967264  ;;  %s3317_s28 = sld [smem:[#allocation33_spill]]  ;;  %s3318_s4 = sld [smem:[#allocation29_spill]] }
 0x162   : > { %s3255_s21 = sand.u32 1, %s3315_s16   ;;  %p775_p10 = scmp.lt.s32.totalorder %s3316_s5, 1 }
 0x163   : > { %s1739_s29 = sshll.u32 %s3255_s21, 3  ;;  %p1742_p3 = scmp.ne.s32.totalorder %s3318_s4, 0 }
 0x164   : > { %s3355_s5 = smov (!%p775_p10, %s3316_s5), 1  ;;  %s3026_s12 = scalar_lea.vmem [#allocation19], %s1739_s29  ;;  %v2077_v0 = vld [vmem:[#allocation9] sm:$0xff] (!%p1742_p3)   ;;  %v2078_v1 = vld [vmem:[#allocation12] sm:$0xff] (!%p1742_p3)   ;;  %v2079_v2 = vld [vmem:[#allocation9 + $0x8] sm:$0xff] (!%p1742_p3)   ;;  %vm823_vm0 = vcmask (!%p1742_p3), 261120  }
 0x165   : > { %s1792_s27 = sshll.u32 %s3355_s5, 4  ;;  %785 = sbr.rel (%p1742_p3) target bundleno = 585 (0x249), region = 136  ;;  %1823 = vmatprep.subr.bf16.mxu0 (!%p1742_p3), %v2077_v0  ;;  %1831 = vmatprep.subr.bf16.mxu1 (!%p1742_p3), %v2078_v1  ;;  %v2080_v3 = vld [vmem:[#allocation12 + $0x8] sm:$0xff] (!%p1742_p3)   ;;  %v880_v6 = vld [vmem:[%s2988_s9 + $0x8] sm:$0xff] (!%p1742_p3)  ;;  %v881_v9 = vld [vmem:[%s2988_s9 + $0x10] sm:$0xff] (!%p1742_p3) }
 0x166   : > { %s3024_s23 = scalar_lea.vmem %s3317_s28, %s1792_s27  ;;  %1824 = vmatpush3.bf16.msra.mxu0 (!%p1742_p3), %v2077_v0  ;;  %1832 = vmatpush3.bf16.msra.mxu1 (!%p1742_p3), %v2078_v1  ;;  %v879_v5 = vld [vmem:[%s2988_s9] sm:$0xff] (!%p1742_p3)  ;;  %v882_v10 = vld [vmem:[%s2988_s9 + $0x18] sm:$0xff] (!%p1742_p3)  ;;  %v1743_v13 = vld [vmem:[#allocation10] ss:$0 sm:$0xff] (!%p1742_p3) }
 0x167   : > { %1825 = vmatprep.subr.bf16.mxu0 (!%p1742_p3), %v2079_v2  ;;  %v2081_v4 = vld [vmem:[%s3024_s23] sm:$0xff] (!%p1742_p3)   ;;  %1833 = vmatprep.subr.bf16.mxu1 (!%p1742_p3), %v2080_v3  ;;  %v883_v7 = vpack.c.bf16 (!%p1742_p3), %v880_v6, %v879_v5  ;;  %v2082_v8 = vld [vmem:[%s3024_s23 + $0x8] sm:$0xff] (!%p1742_p3)   ;;  %v884_v11 = vpack.c.bf16 (!%p1742_p3), %v882_v10, %v881_v9 }
 0x168   : > { %1827 = vmatprep.mubr.msk.bf16.mxu0 (!%p1742_p3), %vm823_vm0, %v2081_v4  ;;  %v1750_v15 = vld [vmem:[#allocation13] ss:$0 sm:$0xff] (!%p1742_p3) }
 0x169   : > { %1835 = vmatprep.mubr.msk.bf16.mxu1 (!%p1742_p3), %vm823_vm0, %v883_v7 }
 0x16a   : > { %1826 = vmatpush3.bf16.msra.mxu0 (!%p1742_p3), %v2079_v2  ;;  %1834 = vmatpush3.bf16.msra.mxu1 (!%p1742_p3), %v2080_v3 }
 0x16d   : > { %1828 = vmatmul.mubr.msk.bf16.vlgmr.msra.gmra.mrb[0].mxu0 %vm823_vm0, %v2082_v8  ;;  %1836 = vmatmul.mubr.msk.bf16.vlgmr.msra.gmra.mrb[0].mxu1 %vm823_vm0, %v884_v11 }
 0x240   : > { %v1829_v12 = vpop.f32.mrb[0].mxu0  ;;  %v1837_v14 = vpop.f32.mrb[0].mxu1 }
 0x241   : > { %v864_v16 = vpop.f32.mrb[1].mxu0  ;;  %v948_v17 = vpop.f32.mrb[1].mxu1  ;;  %v873_v19 = vadd.f32 %v1829_v12, %v1743_v13  ;;  %v957_v23 = vadd.f32 %v1837_v14, %v1750_v15 }
 0x242   : > { %v1830_v18 = vpop.f32.mrb[2].mxu0  ;;  %v1838_v21 = vpop.f32.mrb[2].mxu1  ;;  %v865_v24 = vadd.f32 %v1743_v13, %v864_v16  ;;  %v949_v28 = vadd.f32 %v1750_v15, %v948_v17 }
 0x243   : > { %v876_v20 = vadd.f32 %v1830_v18, %v1743_v13  ;;  %v867_v22 = vpop.f32.mrb[3].mxu0  ;;  %v960_v25 = vadd.f32 %v1838_v21, %v1750_v15  ;;  %v951_v27 = vpop.f32.mrb[3].mxu1 }
 0x244   : > { %v868_v26 = vadd.f32 %v1743_v13, %v867_v22  ;;  %v952_v30 = vadd.f32 %v1750_v15, %v951_v27 }
 0x245   : > { %v964_v29 = vpack.c.bf16 %v876_v20, %v873_v19  ;;  %v968_v31 = vpack.c.bf16 %v960_v25, %v957_v23 }
 0x246   : > { %v963_v32 = vpack.c.bf16 %v868_v26, %v865_v24  ;;  %v967_v33 = vpack.c.bf16 %v952_v30, %v949_v28 }
 0x247   : > { %966 = vst.msk [vmem:[#allocation2 + $0x8] sm:$0xff] %vm823_vm0, %v964_v29  ;;  %970 = vst.msk [vmem:[#allocation3 + $0x8] sm:$0xff] %vm823_vm0, %v968_v31 }
 0x248   : > { %965 = vst.msk [vmem:[#allocation2] sm:$0xff] %vm823_vm0, %v963_v32  ;;  %969 = vst.msk [vmem:[#allocation3] sm:$0xff] %vm823_vm0, %v967_v33 }
 0x249 PF: > { %s3319_s7 = sld [smem:[#allocation35_spill]]  ;;  %s3320_s11 = sld [smem:[#allocation29_spill]]  ;;  %v2523_v35 = vmov 0.0   ;;  %vm2524_vm1 = vmmov 0   ;;  %vm1009_vm2 = vcmask 261120   ;;  %vm1408_vm3 = vcmask 523264  }
 0x24a   : > { %1839 = vmatprep.subr.bf16.mxu1 %v2523_v35  ;;  %1855 = vmatprep.subr.bf16.mxu0 %v2523_v35  ;;  %s3321_s4 = sld [smem:[#allocation36_spill]]  ;;  %v1762_v50 = vld [vmem:[%s683_s2] ss:$0 sm:$0xff]  ;;  %s3322_s26 = sld [smem:[#allocation41_spill]]  ;;  %v1765_v21 = vld [vmem:[#allocation15] ss:$0 sm:$0xff] }
 0x24b   : > { %1843 = vmatprep.mubr.msk.bf16.mxu1 %vm2524_vm1, %v2523_v35  ;;  %1859 = vmatprep.mubr.msk.bf16.mxu0 %vm2524_vm1, %v2523_v35  ;;  %s3326_s18 = sld [smem:[#allocation48_spill]]  ;;  %s3327_s2 = sld [smem:[#allocation30_spill]]  ;;  %vm1507_vm4 = vcmask 257024  }
 0x24c   : > { %s3329_s28 = sld [smem:[#allocation50_spill]]  ;;  %p3333_p9 = scmp.ne.s32.totalorder %s3297_s17, 0 }
 0x24e   : > { %v1056_v40 = vld [vmem:[#allocation2 + $0x8] sm:$0xff]  ;;  %v1134_v60 = vld [vmem:[#allocation3 + $0x8] sm:$0xff] }
 0x24f   : > { %v2083_v34 = vld [vmem:[%s3319_s7] sm:$0xff]   ;;  %v2084_v36 = vld [vmem:[%s3319_s7 + $0x8] sm:$0xff]   ;;  %s1755_s29 = sshll.u32 %s3320_s11, 4  ;;  %v1071_v41 = vsel %vm1009_vm2, %v1056_v40, 0  ;;  %v1133_v59 = vld [vmem:[#allocation3] sm:$0xff]  ;;  %s1786_s8 = sshll.u32 %s3320_s11, 1 }
 0x250   : > { %1840 = vmatpush3.bf16.msra.mxu1 %v2083_v34  ;;  %s972_s27 = sshra.s32 %s1755_s29, 3  ;;  %v1055_v38 = vld [vmem:[#allocation2] sm:$0xff]  ;;  %1856 = vmatpush3.bf16.msra.mxu0 %v1133_v59  ;;  %v2087_v9 = vld [vmem:[%s3322_s26 + $0x8] sm:$0xff]   ;;  %s978_s5 = scalar_lea.vmem %s2988_s9, %s1755_s29 [#allocation4] }
 0x251   : > { %1841 = vmatprep.subr.bf16.mxu1 %v2523_v35  ;;  %s1756_s6 = sshll.u32 %s972_s27, 2  ;;  %v1068_v39 = vsel %vm1009_vm2, %v1055_v38, 0  ;;  %v1757_v42 = vld [vmem:[%s3321_s4] ss:$0 sm:$0xff]  ;;  %1857 = vmatprep.subr.bf16.mxu0 %v2523_v35  ;;  %v980_v27 = vld [vmem:[%s978_s5 + $0x8] sm:$0xff]  ;;  %s3323_s27 = sld [smem:[#allocation45_spill]] }
 0x252   : > { %s975_s30 = scalar_lea.vmem %s3024_s23, %s1756_s6  ;;  %v2086_v8 = vld [vmem:[%s3322_s26] sm:$0xff]   ;;  %s3324_s4 = sld [smem:[#allocation47_spill]] }
 0x253   : > { %v2085_v37 = vld [vmem:[%s975_s30] sm:$0xff]   ;;  %s3325_s30 = sld [smem:[#allocation46_spill]]  ;;  %s1787_s16 = sshll.u32 %s3327_s2, 2 }
 0x254   : > { %1842 = vmatpush3.bf16.msra.mxu1 %v2084_v36  ;;  %1858 = vmatpush3.bf16.msra.mxu0 %v1134_v60  ;;  %v979_v23 = vld [vmem:[%s978_s5] sm:$0xff]  ;;  %s3328_s29 = sld [smem:[#allocation49_spill]]  ;;  %s3330_s23 = sld [smem:[#allocation28_spill]] }
 0x255   : > { %1847 = vmatprep.subr.bf16.mxu1 %v2523_v35  ;;  %1863 = vmatprep.subr.bf16.mxu0 %v2523_v35  ;;  %s1526_s2 = sshll.u32 %s3026_s12, 4  ;;  %s3150_s2 = int_to_ptr.vmem [resolvable:$true] %s1526_s2 }
 0x256   : > { %s2366_s6 = scalar_lea.vmem %s3150_s2, 128 }
 0x257   : > { %1844 = vmatmul.mubr.msk.bf16.vlgmr.msra.gmra.mrb[0].mxu1 %vm1009_vm2, %v2085_v37  ;;  %p2367_p7 = scmp.ne.s32.totalorder %s3150_s2, %s2366_s6 }
 0x258   : > { %1851 = vmatprep.mubr.msk.bf16.mxu1 %vm2524_vm1, %v2523_v35 }
 0x259   : > { %p2368_p4 = pnand %p2367_p7, %p3333_p9 }
 0x25b   : > { %p2369_p0 = pneg %p2368_p4 }
 0x25d   : > { %1848 = vmatpush3.bf16.xpose.msra.mxu1 %v1068_v39 }
 0x25e   : > { %1849 = vmatprep.subr.bf16.mxu1 %v2523_v35 }
 0x265   : > { %1850 = vmatpush3.bf16.xpose.msra.mxu1 %v1071_v41 }
 0x266   : > { %1871 = vmatprep.subr.bf16.mxu1 %v2523_v35 }
 0x32a   : > { %v1047_v43 = vpop.f32.mrb[0].mxu1 }
 0x32b   : > { %v1845_v44 = vpop.f32.mrb[1].mxu1  ;;  %v1048_v46 = vadd.f32 %v1757_v42, %v1047_v43 }
 0x32c   : > { %v1050_v45 = vpop.f32.mrb[2].mxu1 }
 0x32d   : > { %v1051_v47 = vadd.f32 %v1757_v42, %v1050_v45  ;;  %v1846_v48 = vpop.f32.mrb[3].mxu1  ;;  %v2088_v45 = vld [vmem:[%s3323_s27] sm:$0xff]  }
 0x32e   : > { %v2091_v48 = vld [vmem:[%s3324_s4 + $0x8] sm:$0xff]  }
 0x32f   : > { %v1054_v49 = vpack.c.bf16 %v1051_v47, %v1048_v46  ;;  %v2089_v46 = vld [vmem:[%s3323_s27 + $0x8] sm:$0xff]   ;;  %v2090_v47 = vld [vmem:[%s3324_s4] sm:$0xff]  }
 0x331   : > { %1852 = vmatmul.mubr.msk.bf16.vlgmr.msra.gmra.mrb[4].mxu1 %vm1009_vm2, %v1054_v49 }
 0x332   : > { %1875 = vmatprep.mubr.msk.bf16.mxu1 %vm2524_vm1, %v2523_v35  ;;  %1872 = vmatpush3.bf16.msra.mxu1 %v2088_v45  ;;  %v1782_v45 = vld [vmem:[%s3329_s28] ss:$0 sm:$0xff] }
 0x333   : > { %1873 = vmatprep.subr.bf16.mxu1 %v2523_v35 }
 0x336   : > { %1874 = vmatpush3.bf16.msra.mxu1 %v2089_v46 }
 0x404   : > { %v1107_v51 = vpop.f32.mrb[4].mxu1 }
 0x405   : > { %v1108_v52 = vadd.f32 %v1762_v50, %v1107_v51  ;;  %v1853_v53 = vpop.f32.mrb[5].mxu1 }
 0x406   : > { %v1110_v54 = vpop.f32.mrb[6].mxu1 }
 0x407   : > { %v1111_v55 = vadd.f32 %v1762_v50, %v1110_v54  ;;  %v1854_v56 = vpop.f32.mrb[7].mxu1  ;;  %v1114_v57 = vsel %vm1009_vm2, %v1108_v52, -inf }
 0x408   : > { %1115 = vmax.xlane.f32.xlu0 %v1114_v57  ;;  %v1769_v56 = vld [vmem:[#allocation16] ss:$0 sm:$0xff] }
 0x409   : > { %v1117_v58 = vsel %vm1009_vm2, %v1111_v55, -inf }
 0x40c   : > { %1118 = vmax.xlane.f32.xlu0 %v1117_v58 }
 0x495   : > { %v1116_v61 = vpop.xlane.xlu0 %1115 }
 0x496   : > { %v1120_v62 = vsub.f32 %v1108_v52, %v1116_v61  ;;  %v1770_v61 = vld [vmem:[#allocation18] ss:$0 sm:$0xff] }
 0x498   : > { %v1122_v63 = vmul.f32 1.442695, %v1120_v62 }
 0x499   : > { %v1119_v0 = vpop.xlane.xlu0 %1118 }
 0x49a   : > { %2094 = vpow2.f32 %v1122_v63  ;;  %v1121_v1 = vsub.f32 %v1111_v55, %v1119_v0 }
 0x49c   : > { %v1124_v2 = vmul.f32 1.442695, %v1121_v1 }
 0x49e   : > { %2096 = vpow2.f32 %v1124_v2  ;;  %v2092_v2 = vld [vmem:[%s3324_s4 + $0x10] sm:$0xff]  }
 0x4a4   : > { %v2095_v3 = vpop.eup %2094 }
 0x4a5   : > { %v1126_v4 = vsel %vm1009_vm2, %v2095_v3, 0.0 }
 0x4a6   : > { %1127 = vadd.xlane.f32.xlu1 %v1126_v4  ;;  %v1771_v4 = vld [vmem:[%s3325_s30] ss:$0 sm:$0xff]  ;;  %s2525_s30 = smov [#allocation19]  }
 0x4a7   : > { %s2370_s28 = sshll.u32 %s2525_s30, 4  ;;  %s2371_s28 = int_to_ptr.vmem [resolvable:$false] %s2370_s28 }
 0x4a8   : > { %v2097_v5 = vpop.eup %2096  ;;  %p2373_p5 = scmp.lt.s32.totalorder %s3150_s2, %s2371_s28 }
 0x4a9   : > { %v1129_v6 = vsel %vm1009_vm2, %v2097_v5, 0.0  ;;  %v1132_v7 = vpack.c.bf16 %v2097_v5, %v2095_v3  ;;  %v2093_v3 = vld [vmem:[%s3324_s4 + $0x18] sm:$0xff]  }
 0x4aa   : > { %1130 = vadd.xlane.f32.xlu1 %v1129_v6 }
 0x4ab   : > { %1860 = vmatmul.mubr.msk.bf16.vlgmr.msra.gmra.mrb[0].mxu0 %vm1009_vm2, %v1132_v7 }
 0x4ac   : > { %1867 = vmatprep.mubr.msk.bf16.mxu0 %vm2524_vm1, %v2523_v35  ;;  %1864 = vmatpush3.bf16.msra.mxu0 %v2086_v8 }
 0x4ad   : > { %1865 = vmatprep.subr.bf16.mxu0 %v2523_v35 }
 0x4b0   : > { %1866 = vmatpush3.bf16.msra.mxu0 %v2087_v9 }
 0x4b1   : > { %1879 = vmatprep.subr.bf16.mxu0 %v2523_v35 }
 0x533   : > { %v1128_v10 = vpop.xlane.xlu1 %1127 }
 0x534   : > { %2098 = vrcp.f32 %v1128_v10 }
 0x537   : > { %v1131_v11 = vpop.xlane.xlu1 %1130 }
 0x538   : > { %2100 = vrcp.f32 %v1131_v11 }
 0x53e   : > { %v2099_v13 = vpop.eup %2098 }
 0x542   : > { %v2101_v15 = vpop.eup %2100 }
 0x57e   : > { %v1172_v12 = vpop.f32.mrb[0].mxu0 }
 0x57f   : > { %v1861_v14 = vpop.f32.mrb[1].mxu0  ;;  %v1181_v17 = vmul.f32 %v2099_v13, %v1172_v12 }
 0x580   : > { %v1175_v16 = vpop.f32.mrb[2].mxu0 }
 0x581   : > { %v1182_v18 = vmul.f32 %v2101_v15, %v1175_v16  ;;  %v1862_v19 = vpop.f32.mrb[3].mxu0 }
 0x583   : > { %v1183_v20 = vpack.c.bf16 %v1182_v18, %v1181_v17 }
 0x585   : > { %1868 = vmatmul.mubr.msk.bf16.vlgmr.msra.gmra.mrb[4].mxu0 %vm1009_vm2, %v1183_v20 }
 0x586   : > { %1887 = vmatprep.mubr.msk.bf16.mxu0 %vm2524_vm1, %v2523_v35  ;;  %1880 = vmatpush3.bf16.msra.mxu0 %v2090_v47 }
 0x587   : > { %1881 = vmatprep.subr.bf16.mxu0 %v2523_v35 }
 0x58a   : > { %1882 = vmatpush3.bf16.msra.mxu0 %v2091_v48 }
 0x58b   : > { %1883 = vmatprep.subr.bf16.mxu0 %v2523_v35 }
 0x58e   : > { %1884 = vmatpush3.bf16.msra.mxu0 %v2092_v2 }
 0x58f   : > { %1885 = vmatprep.subr.bf16.mxu0 %v2523_v35  ;;  %v1775_v35 = vld [vmem:[%s3326_s18] ss:$0 sm:$0xff]  ;;  %s1523_s18 = sadd.s32 %s1787_s16, %s1786_s8  ;;  %s3332_s8 = sand.u32 1, %s3330_s23  }
 0x590   : > { %s1788_s11 = sshll.u32 %s1523_s18, 6  ;;  %s3156_s16 = scalar_lea.sflag [#allocation6], %s3332_s8 }
 0x591   : > { %s2372_s18 = scalar_lea.vmem %s2371_s28, 256 }
 0x592   : > { %1886 = vmatpush3.bf16.msra.mxu0 %v2093_v3  ;;  %p2374_p13 = scmp.lt.s32.totalorder %s2372_s18, %s2366_s6 }
 0x594   : > { %p2375_p1 = por %p2374_p13, %p2373_p5 }
 0x596   : > { %p2376_p12 = pnand %p2375_p1, %p2369_p0 }
 0x658   : > { %v1244_v22 = vpop.f32.mrb[4].mxu0 }
 0x659   : > { %v1245_v24 = vadd.f32 %v1765_v21, %v1244_v22  ;;  %v1869_v25 = vpop.f32.mrb[5].mxu0 }
 0x65a   : > { %v1247_v26 = vpop.f32.mrb[6].mxu0 }
 0x65b   : > { %v1248_v28 = vadd.f32 %v1765_v21, %v1247_v26  ;;  %v1870_v29 = vpop.f32.mrb[7].mxu0  ;;  %v1251_v30 = vadd.f32 %v1245_v24, %v979_v23 }
 0x65d   : > { %v1253_v31 = vsel %vm1009_vm2, %v1251_v30, 0.0  ;;  %v1252_v32 = vadd.f32 %v1248_v28, %v980_v27 }
 0x65e   : > { %1254 = vadd.xlane.f32.xlu0 %v1253_v31 }
 0x65f   : > { %v1256_v33 = vsel %vm1009_vm2, %v1252_v32, 0.0 }
 0x660   : > { %1257 = vadd.xlane.f32.xlu1 %v1256_v33 }
 0x6eb   : > { %v1255_v34 = vpop.xlane.xlu0 %1254 }
 0x6ec   : > { %v1260_v36 = vmul.f32 0.03125, %v1255_v34 }
 0x6ed   : > { %v1258_v37 = vpop.xlane.xlu1 %1257 }
 0x6ee   : > { %v1262_v38 = vsub.f32 %v1251_v30, %v1260_v36  ;;  %v1261_v39 = vmul.f32 0.03125, %v1258_v37 }
 0x6f0   : > { %v1263_v40 = vsub.f32 %v1252_v32, %v1261_v39  ;;  %v1264_v41 = vmul.f32 %v1262_v38, %v1262_v38 }
 0x6f2   : > { %v1266_v42 = vsel %vm1009_vm2, %v1264_v41, 0.0  ;;  %v1265_v43 = vmul.f32 %v1263_v40, %v1263_v40 }
 0x6f3   : > { %1267 = vadd.xlane.f32.xlu0 %v1266_v42  ;;  %v1781_v42 = vld [vmem:[%s3328_s29] ss:$0 sm:$0xff]  ;;  %s3331_s29 = sld [smem:[#allocation51_spill]] }
 0x6f4   : > { %v1269_v44 = vsel %vm1009_vm2, %v1265_v43, 0.0 }
 0x6f5   : > { %1270 = vadd.xlane.f32.xlu1 %v1269_v44 }
 0x6f9   : > { %s3148_s21 = scalar_lea.hbm %s3331_s29, %s1788_s11 }
 0x780   : > { %v1268_v49 = vpop.xlane.xlu0 %1267 }
 0x781   : > { %v1272_v50 = vmul.f32 0.03125, %v1268_v49 }
 0x782   : > { %v1271_v51 = vpop.xlane.xlu1 %1270 }
 0x783   : > { %v1274_v52 = vadd.f32 1e-05, %v1272_v50  ;;  %v1273_v53 = vmul.f32 0.03125, %v1271_v51 }
 0x785   : > { %2102 = vrsqrt.f32 %v1274_v52  ;;  %v1275_v54 = vadd.f32 1e-05, %v1273_v53 }
 0x787   : > { %2104 = vrsqrt.f32 %v1275_v54 }
 0x78f   : > { %v2103_v55 = vpop.eup %2102 }
 0x790   : > { %v1278_v57 = vmul.f32 %v2103_v55, %v1262_v38 }
 0x791   : > { %v2105_v58 = vpop.eup %2104 }
 0x792   : > { %v1287_v59 = vmul.f32 %v1769_v56, %v1278_v57  ;;  %v1279_v60 = vmul.f32 %v2105_v58, %v1263_v40 }
 0x794   : > { %v1288_v62 = vmul.f32 %v1769_v56, %v1279_v60  ;;  %v1296_v63 = vadd.f32 %v1770_v61, %v1287_v59 }
 0x796   : > { %v1297_v0 = vadd.f32 %v1770_v61, %v1288_v62 }
 0x798   : > { %v1298_v1 = vpack.c.bf16 %v1297_v0, %v1296_v63 }
 0x79a   : > { %1876 = vmatmul.mubr.msk.bf16.vlgmr.msra.gmra.mrb[8].mxu1 %vm1009_vm2, %v1298_v1 }
 0x86d   : > { %v1359_v5 = vpop.f32.mrb[8].mxu1 }
 0x86e   : > { %v1360_v6 = vadd.f32 %v1771_v4, %v1359_v5  ;;  %v1877_v7 = vpop.f32.mrb[9].mxu1 }
 0x86f   : > { %v1362_v8 = vpop.f32.mrb[10].mxu1 }
 0x870   : > { %v1363_v9 = vadd.f32 %v1771_v4, %v1362_v8  ;;  %v1878_v10 = vpop.f32.mrb[11].mxu1  ;;  %v1366_v11 = vmax.f32 %v1360_v6, 0.0 }
 0x872   : > { %v1367_v12 = vmax.f32 %v1363_v9, 0.0 }
 0x874   : > { %v1368_v13 = vpack.c.bf16 %v1367_v12, %v1366_v11 }
 0x876   : > { %1888 = vmatmul.mubr.msk.bf16.vlgmr.msra.gmra.mrb[8].mxu0 %vm1408_vm3, %v1368_v13 }
 0x949   : > { %v1446_v14 = vpop.f32.mrb[8].mxu0 }
 0x94a   : > { %v1447_v15 = vadd.f32 %v1775_v35, %v1446_v14  ;;  %v1889_v16 = vpop.f32.mrb[9].mxu0 }
 0x94b   : > { %v1449_v17 = vpop.f32.mrb[10].mxu0 }
 0x94c   : > { %v1450_v18 = vadd.f32 %v1775_v35, %v1449_v17  ;;  %v1890_v19 = vpop.f32.mrb[11].mxu0  ;;  %v1453_v20 = vadd.f32 %v1447_v15, %v1296_v63 }
 0x94e   : > { %v1455_v21 = vsel %vm1009_vm2, %v1453_v20, 0.0  ;;  %v1454_v22 = vadd.f32 %v1450_v18, %v1297_v0 }
 0x94f   : > { %1456 = vadd.xlane.f32.xlu0 %v1455_v21 }
 0x950   : > { %v1458_v23 = vsel %vm1009_vm2, %v1454_v22, 0.0 }
 0x951   : > { %1459 = vadd.xlane.f32.xlu1 %v1458_v23 }
 0x9dc   : > { %v1457_v24 = vpop.xlane.xlu0 %1456 }
 0x9dd   : > { %v1461_v25 = vmul.f32 0.03125, %v1457_v24 }
 0x9de   : > { %v1460_v26 = vpop.xlane.xlu1 %1459 }
 0x9df   : > { %v1463_v27 = vsub.f32 %v1453_v20, %v1461_v25  ;;  %v1462_v28 = vmul.f32 0.03125, %v1460_v26 }
 0x9e1   : > { %v1464_v29 = vsub.f32 %v1454_v22, %v1462_v28  ;;  %v1465_v30 = vmul.f32 %v1463_v27, %v1463_v27 }
 0x9e3   : > { %v1467_v31 = vsel %vm1009_vm2, %v1465_v30, 0.0  ;;  %v1466_v32 = vmul.f32 %v1464_v29, %v1464_v29 }
 0x9e4   : > { %1468 = vadd.xlane.f32.xlu0 %v1467_v31 }
 0x9e5   : > { %v1470_v33 = vsel %vm1009_vm2, %v1466_v32, 0.0 }
 0x9e6   : > { %1471 = vadd.xlane.f32.xlu1 %v1470_v33 }
 0xa71   : > { %v1469_v34 = vpop.xlane.xlu0 %1468 }
 0xa72   : > { %v1473_v36 = vmul.f32 0.03125, %v1469_v34 }
 0xa73   : > { %v1472_v37 = vpop.xlane.xlu1 %1471 }
 0xa74   : > { %v1475_v38 = vadd.f32 1e-05, %v1473_v36  ;;  %v1474_v39 = vmul.f32 0.03125, %v1472_v37 }
 0xa76   : > { %2106 = vrsqrt.f32 %v1475_v38  ;;  %v1476_v40 = vadd.f32 1e-05, %v1474_v39 }
 0xa78   : > { %2108 = vrsqrt.f32 %v1476_v40 }
 0xa80   : > { %v2107_v41 = vpop.eup %2106 }
 0xa81   : > { %v1479_v43 = vmul.f32 %v2107_v41, %v1463_v27 }
 0xa82   : > { %v2109_v44 = vpop.eup %2108 }
 0xa83   : > { %v1488_v46 = vmul.f32 %v1781_v42, %v1479_v43  ;;  %v1480_v47 = vmul.f32 %v2109_v44, %v1464_v29 }
 0xa85   : > { %v1489_v48 = vmul.f32 %v1781_v42, %v1480_v47  ;;  %v1497_v49 = vadd.f32 %v1782_v45, %v1488_v46 }
 0xa87   : > { %v1498_v50 = vadd.f32 %v1782_v45, %v1489_v48  ;;  %v1793_v51 = vpack.c.bf16 %v1497_v49, %v1497_v49 }
 0xa89   : > { %v1794_v52 = vpack.c.bf16 %v1498_v50, %v1498_v50  ;;  %1508 = vst.msk [vmem:[%s3026_s12] sm:$0xf] %vm1507_vm4, %v1793_v51 }
 0xa8b   : > { %1509 = vst.msk [vmem:[%s3026_s12 + $0x4] sm:$0xf] %vm1507_vm4, %v1794_v52 }
 0xa8c   : > { %2379 = shalt.err (!%p2376_p12)
}
 0xa8d   : > { %s2380_s12 = scalar_lea.hbm %s3148_s21, 128  ;;  %s2384_s5 = scalar_lea.hbm %s3331_s29, 512 }
 0xa8e   : > { %p2381_p2 = scmp.ne.s32.totalorder %s3148_s21, %s2380_s12  ;;  %p2385_p8 = scmp.lt.u32.totalorder %s3148_s21, %s3331_s29 }
 0xa8f   : > { %p2386_p10 = scmp.lt.u32.totalorder %s2384_s5, %s2380_s12  ;;  %p2388_p7 = scmp.lt.u32.totalorder %s2380_s12, %s3148_s21 }
 0xa90   : > { %p2382_p11 = pnand %p2381_p2, %p3333_p9 }
 0xa91   : > { %p2387_p3 = por %p2386_p10, %p2385_p8 }
 0xa92   : > { %p2383_p6 = pneg %p2382_p11 }
 0xa93   : > { %p2389_p4 = por %p2388_p7, %p2387_p3 }
 0xa95   : > { %p2390_p0 = pnand %p2389_p4, %p2383_p6 }
 0xa97   : > { %2393 = shalt.err (!%p2390_p0)
}
 0xa98   : > { %s2526_s6 = smov 64   ;;  %s2527_s30 = smov 4  }
 0xa99   : > { %1923 = dma.vmem_to_hbm [thread:$0]  (%p3333_p9), %s3150_s2, 128, %s3148_s21, %s3156_s16, %s2526_s6, %s2526_s6, %s2527_s30  }
 0xa9a PF: > { %s3334_s28 = sld [smem:[#allocation27_spill]]  ;;  %p1973_p5 = scmp.ge.s32.totalorder %s2508_s3, 2 }
 0xa9b   : > { %p3335_p13 = scmp.ne.s32.totalorder %s3298_s13, 0 }
 0xa9d   : > { %p1955_p1 = pnand %p1973_p5, %p3335_p13 }
 0xaa0   : > { %s1541_s18 = sand.u32 1, %s3334_s28  }
 0xaa1   : > { %s1542_s12 = scalar_lea.sflag [#allocation6], %s1541_s18 }
 0xaa2   : > { %2463 = dma.done.wait (!%p1955_p1), %s1542_s12, 128  }
 0xaa3   : > { %2465 = vsyncadd (!%p1955_p1), %s1542_s12, 4294967168  ;;  %s41_s3 = sadd.s32 1, %s2508_s3   ;;  %s3336_s23 = sld [smem:[#allocation28_spill]] }
 0xaa4   : > { %p38_p12 = scmp.ge.s32.totalorder %s41_s3, 6   ;;  %s3337_s17 = smov %s2896_s0 }
 0xaa5   : > { %s3339_s30 = smov %s2476_s20  ;;  %s3340_s20 = smov %s2899_s14 }
 0xaa6   : > { %s3341_s21 = smov %s2484_s1  ;;  %s3342_s1 = smov %s2488_s22 }
 0xaa7   : > { %s3343_s22 = smov %s3337_s17  ;;  %s3344_s2 = smov %s2500_s24 }
 0xaa8   : > { %s3346_s24 = smov %s3349_s19  ;;  %40 = sbr.rel (!%p38_p12) target bundleno = 35 (0x23), region = 191 }
 0xaa9   : > { %s3338_s0 = smov %s3336_s23  ;;  %s3345_s23 = smov %s2504_s25 }
 0xaaa   : > { %s3347_s25 = smov %s3353_s15 }
 0xaaf   :  { %1547 = vsyncpa [#allocation5], 1 }
 0xab0   :  { %1549 = vsyncpa [#allocation5 + $0x1], 1 }
 0xab1   :  { %1550 = vsyncpa [#allocation8], 1 }
 0xab2   :  { %1552 = vsyncpa [#allocation8 + $0x1], 1 }
 0xab3   :  { %1553 = vsyncpa [#allocation11], 1 }
 0xab4   :  { %1554 = vsyncpa [#allocation14], 1 }
 0xab5   :  { %1555 = vsyncpa [#allocation17], 1 }
 0xab6   :  { %1556 = vsyncpa [#allocation6], 1 }
 0xab7   :  { %1558 = vsyncpa [#allocation6 + $0x1], 1 }

</bundles_post_ra>
